<compile_context>
chip_gen: v7x
topology: tpu7x:2x2x1
jax: 0.10.0
libtpu: 0.0.40
codegen_flags: <defaults>
</compile_context>

<pallas_src>
import math
import jax
import jax.numpy as jnp
from jax.experimental import pallas as pl
from jax.experimental.pallas import tpu as pltpu

# ---- small, module-consistent shapes ------------------------------------
B = 2            # batch
S = 8            # sequence length
DIN = 4          # input_dim (len(FEATURE_COLUMNS))
D = 32           # d_model
H = 4            # n_heads
L = 2            # n_layers
F = 3            # forecast_steps
HD = D // H      # head dim
FF = 4 * D       # dim_feedforward
BS = B * S
LANE = 128

# ---- packed-operand layout (all row offsets are multiples of 8) ----------
# matrix blob: (MAT_ROWS, 128) f32
M_WIN = 0                                  # rows [0, DIN): input proj (DIN, D)
M_LAYER = 8                                # per-layer slab of 224 rows
M_QKV, M_WO, M_W1, M_W2 = 0, 32, 64, 96    # offsets inside a layer slab
M_LAYER_ROWS = 224
M_WDEC = M_LAYER + L * M_LAYER_ROWS        # decoder (D, 128): F real cols
MAT_ROWS = M_WDEC + D                      # = 488

# vector blob: (VEC_ROWS, 128) f32
V_POS = 0                                  # rows [0, BS): pos_embedding + b_in
V_LAYER = BS                               # 8 rows per layer:
V_LN1W, V_LN1B, V_BQKV, V_BO, V_LN2W, V_LN2B, V_B1, V_B2 = range(8)
V_FINAL = BS + 8 * L                       # lnf_w, lnf_b, decoder bias
VEC_ROWS = ((V_FINAL + 3 + 7) // 8) * 8    # = 40


def transformer_kernel(x_ref, mats_ref, vecs_ref, out_ref):
    """Fused input-proj + pos-enc + L pre-norm encoder layers + LN + decoder."""

    def layer_norm(h, w, b, eps):
        mu = jnp.mean(h, axis=-1, keepdims=True)
        c = h - mu
        var = jnp.mean(c * c, axis=-1, keepdims=True)
        return c * jax.lax.rsqrt(var + eps) * w + b

    # clamp(past_values, -1e5, 1e5); rows are (b, s) flattened — stay 2-D.
    x = jnp.clip(x_ref[...], -1e5, 1e5)                              # (BS, DIN)

    # input projection; bias + learnable positional encoding are pre-folded
    # into the (BS, D) block at vecs[V_POS : V_POS + BS].
    src = jnp.dot(x, mats_ref[M_WIN:M_WIN + DIN, 0:D],
                  preferred_element_type=jnp.float32)
    src = src + vecs_ref[V_POS:V_POS + BS, 0:D]                      # (BS, D)

    for l in range(L):
        mb = M_LAYER + l * M_LAYER_ROWS
        vb = V_LAYER + l * 8
        h = src

        # --- self-attention block: h + MHA(LN1(h)) ------------------------
        x1 = layer_norm(h,
                        vecs_ref[vb + V_LN1W:vb + V_LN1W + 1, 0:D],
                        vecs_ref[vb + V_LN1B:vb + V_LN1B + 1, 0:D], 1e-5)
        # qkv columns are host-reordered per head: [q_h | k_h | v_h] * H,
        # with the Q part pre-scaled by 1/sqrt(HD).
        qkv = jnp.dot(x1, mats_ref[mb + M_QKV:mb + M_QKV + D, 0:3 * D],
                      preferred_element_type=jnp.float32)
        qkv = qkv + vecs_ref[vb + V_BQKV:vb + V_BQKV + 1, 0:3 * D]   # (BS, 3D)
        qkv3 = qkv.reshape(B, S, 3 * D)

        # Single leading (B*H) batch dim -> two batched einsums per layer.
        qkv_bh = jnp.concatenate(
            [qkv3[:, :, hh * 3 * HD:(hh + 1) * 3 * HD] for hh in range(H)],
            axis=0)                                                  # (H*B, S, 3*HD)
        q = qkv_bh[:, :, 0:HD]
        k = qkv_bh[:, :, HD:2 * HD]
        v = qkv_bh[:, :, 2 * HD:3 * HD]

        sc = jnp.einsum('bqd,bkd->bqk', q, k,
                        preferred_element_type=jnp.float32)          # (H*B, S, S)
        sc = sc - jnp.max(sc, axis=-1, keepdims=True)
        p = jnp.exp(sc)
        p = p * pl.reciprocal(jnp.sum(p, axis=-1, keepdims=True), approx=True)
        o = jnp.einsum('bqk,bkd->bqd', p, v,
                       preferred_element_type=jnp.float32)           # (H*B, S, HD)

        attn = jnp.concatenate([o[hh * B:(hh + 1) * B] for hh in range(H)],
                               axis=-1).reshape(BS, D)               # heads -> lanes
        attn = jnp.dot(attn, mats_ref[mb + M_WO:mb + M_WO + D, 0:D],
                       preferred_element_type=jnp.float32)
        attn = attn + vecs_ref[vb + V_BO:vb + V_BO + 1, 0:D]
        h = h + attn

        # --- feed-forward block: h + FFN(LN2(h)) --------------------------
        x2 = layer_norm(h,
                        vecs_ref[vb + V_LN2W:vb + V_LN2W + 1, 0:D],
                        vecs_ref[vb + V_LN2B:vb + V_LN2B + 1, 0:D], 1e-5)
        ff = jnp.dot(x2, mats_ref[mb + M_W1:mb + M_W1 + D, 0:FF],
                     preferred_element_type=jnp.float32)
        ff = ff + vecs_ref[vb + V_B1:vb + V_B1 + 1, 0:FF]
        ff = jnp.maximum(ff, 0.0)                                    # ReLU
        ff = jnp.dot(ff, mats_ref[mb + M_W2:mb + M_W2 + FF, 0:D],
                     preferred_element_type=jnp.float32)
        ff = ff + vecs_ref[vb + V_B2:vb + V_B2 + 1, 0:D]
        src = h + ff

    # --- epilogue: last timestep only, final LN (eps=1e-6), decode --------
    last = jnp.concatenate(
        [src[(b + 1) * S - 1:(b + 1) * S, :] for b in range(B)], axis=0)  # (B, D)
    last = layer_norm(last,
                      vecs_ref[V_FINAL + 0:V_FINAL + 1, 0:D],
                      vecs_ref[V_FINAL + 1:V_FINAL + 2, 0:D], 1e-6)
    pred = jnp.dot(last, mats_ref[M_WDEC:M_WDEC + D, :],
                   preferred_element_type=jnp.float32)               # (B, 128) lane-dense
    pred = pred + vecs_ref[V_FINAL + 2:V_FINAL + 3, :]
    out_ref[...] = jnp.clip(pred, -1e5, 1e5)
    # TODO(synk): dropout / NaN-or-inf logging / time_projection / observed-mask
    # branches / checkpoint save-load are no-ops on this inference path.


def transformer_predictor(past_values, packed):
    x2d = past_values.reshape(BS, DIN).astype(jnp.float32)
    vmem = lambda: pl.BlockSpec(memory_space=pltpu.MemorySpace.VMEM)
    flops = (2 * BS * DIN * D
             + L * (2 * BS * D * 3 * D + 2 * BS * D * D + 4 * BS * D * FF
                    + 2 * 2 * H * B * S * S * HD)
             + 2 * B * D * LANE)
    out = pl.pallas_call(
        transformer_kernel,
        out_shape=jax.ShapeDtypeStruct((B, LANE), jnp.float32),
        in_specs=[vmem(), vmem(), vmem()],
        out_specs=vmem(),
        cost_estimate=pl.CostEstimate(
            flops=flops,
            transcendentals=L * H * B * S * S + L * 2 * BS + 64,
            bytes_accessed=(MAT_ROWS + VEC_ROWS) * LANE * 4
                           + BS * DIN * 4 + B * LANE * 4),
    )(x2d, packed["mats"], packed["vecs"])
    return out[:, :F]


# ---- parameter construction (mirrors the PyTorch module init) ------------
def _xavier(key, out_dim, in_dim):
    bound = math.sqrt(6.0 / (in_dim + out_dim))
    return jax.random.uniform(key, (out_dim, in_dim), jnp.float32, -bound, bound)


def make_params(key):
    ks = list(jax.random.split(key, 4 + 8 * L))
    nxt = iter(ks).__next__

    p = {}
    # input_projection: Linear(DIN, D), xavier_uniform weight, zero bias
    p["w_in_t"] = _xavier(nxt(), D, DIN).T                 # (DIN, D)
    p["b_in"] = jnp.zeros((D,), jnp.float32)
    # learnable positional encoding (only first S rows are used)
    p["pos"] = 0.02 * jax.random.normal(nxt(), (S, D), jnp.float32)

    ln1_w, ln1_b, wqkv, bqkv, wo, bo = [], [], [], [], [], []
    ln2_w, ln2_b, w1, b1, w2, b2 = [], [], [], [], [], []
    for _ in range(L):
        ln1_w.append(jnp.ones((D,), jnp.float32))
        ln1_b.append(jnp.zeros((D,), jnp.float32))
        wqkv.append(_xavier(nxt(), 3 * D, D).T)            # (D, 3D), cols [q|k|v]
        bqkv.append(0.01 * jax.random.normal(nxt(), (3 * D,), jnp.float32))
        wo.append(_xavier(nxt(), D, D).T)                  # (D, D)
        bo.append(0.01 * jax.random.normal(nxt(), (D,), jnp.float32))
        ln2_w.append(jnp.ones((D,), jnp.float32))
        ln2_b.append(jnp.zeros((D,), jnp.float32))
        w1.append(_xavier(nxt(), FF, D).T)                 # (D, FF)
        b1.append(0.01 * jax.random.normal(nxt(), (FF,), jnp.float32))
        w2.append(_xavier(nxt(), D, FF).T)                 # (FF, D)
        b2.append(0.01 * jax.random.normal(nxt(), (D,), jnp.float32))

    p["ln1_w"] = jnp.stack(ln1_w); p["ln1_b"] = jnp.stack(ln1_b)
    p["wqkv_t"] = jnp.stack(wqkv); p["bqkv"] = jnp.stack(bqkv)
    p["wo_t"] = jnp.stack(wo);     p["bo"] = jnp.stack(bo)
    p["ln2_w"] = jnp.stack(ln2_w); p["ln2_b"] = jnp.stack(ln2_b)
    p["w1_t"] = jnp.stack(w1);     p["b1"] = jnp.stack(b1)
    p["w2_t"] = jnp.stack(w2);     p["b2"] = jnp.stack(b2)

    # final LayerNorm (eps=1e-6) and decoder Linear(D, F)
    p["lnf_w"] = jnp.ones((D,), jnp.float32)
    p["lnf_b"] = jnp.zeros((D,), jnp.float32)
    p["wdec_t"] = _xavier(nxt(), F, D).T                   # (D, F)
    p["bdec"] = jnp.zeros((F,), jnp.float32)
    return p


def pack_params(p):
    """Pack all weights into two lane-dense blobs at static offsets."""
    scale = 1.0 / math.sqrt(HD)

    def reorder_qkv_w(w_t):        # (D, 3D): cols [q|k|v] -> per-head [q|k|v]*H
        blocks = []
        for hh in range(H):
            blocks.append(w_t[:, 0 * D + hh * HD:0 * D + (hh + 1) * HD] * scale)
            blocks.append(w_t[:, 1 * D + hh * HD:1 * D + (hh + 1) * HD])
            blocks.append(w_t[:, 2 * D + hh * HD:2 * D + (hh + 1) * HD])
        return jnp.concatenate(blocks, axis=1)

    def reorder_qkv_b(b):          # (3D,)
        segs = []
        for hh in range(H):
            segs.append(b[0 * D + hh * HD:0 * D + (hh + 1) * HD] * scale)
            segs.append(b[1 * D + hh * HD:1 * D + (hh + 1) * HD])
            segs.append(b[2 * D + hh * HD:2 * D + (hh + 1) * HD])
        return jnp.concatenate(segs)

    mats = jnp.zeros((MAT_ROWS, LANE), jnp.float32)
    mats = mats.at[M_WIN:M_WIN + DIN, 0:D].set(p["w_in_t"])
    for l in range(L):
        mb = M_LAYER + l * M_LAYER_ROWS
        mats = mats.at[mb + M_QKV:mb + M_QKV + D, 0:3 * D].set(
            reorder_qkv_w(p["wqkv_t"][l]))
        mats = mats.at[mb + M_WO:mb + M_WO + D, 0:D].set(p["wo_t"][l])
        mats = mats.at[mb + M_W1:mb + M_W1 + D, 0:FF].set(p["w1_t"][l])
        mats = mats.at[mb + M_W2:mb + M_W2 + FF, 0:D].set(p["w2_t"][l])
    mats = mats.at[M_WDEC:M_WDEC + D, 0:F].set(p["wdec_t"])

    vecs = jnp.zeros((VEC_ROWS, LANE), jnp.float32)
    pos_eff = p["pos"][None, :, :] + p["b_in"][None, None, :]        # (1, S, D)
    pos_eff = jnp.broadcast_to(pos_eff, (B, S, D)).reshape(BS, D)
    vecs = vecs.at[V_POS:V_POS + BS, 0:D].set(pos_eff)
    for l in range(L):
        vb = V_LAYER + l * 8
        vecs = vecs.at[vb + V_LN1W, 0:D].set(p["ln1_w"][l])
        vecs = vecs.at[vb + V_LN1B, 0:D].set(p["ln1_b"][l])
        vecs = vecs.at[vb + V_BQKV, 0:3 * D].set(reorder_qkv_b(p["bqkv"][l]))
        vecs = vecs.at[vb + V_BO, 0:D].set(p["bo"][l])
        vecs = vecs.at[vb + V_LN2W, 0:D].set(p["ln2_w"][l])
        vecs = vecs.at[vb + V_LN2B, 0:D].set(p["ln2_b"][l])
        vecs = vecs.at[vb + V_B1, 0:FF].set(p["b1"][l])
        vecs = vecs.at[vb + V_B2, 0:D].set(p["b2"][l])
    vecs = vecs.at[V_FINAL + 0, 0:D].set(p["lnf_w"])
    vecs = vecs.at[V_FINAL + 1, 0:D].set(p["lnf_b"])
    vecs = vecs.at[V_FINAL + 2, 0:F].set(p["bdec"])
    return {"mats": mats, "vecs": vecs}


if __name__ == "__main__":
    key = jax.random.PRNGKey(0)
    k_params, k_x = jax.random.split(key)
    params = make_params(k_params)
    packed = pack_params(params)
    past_values = jax.random.normal(k_x, (B, S, DIN), jnp.float32)

    pred = transformer_predictor(past_values, packed)
    jax.block_until_ready(pred)
    assert pred.shape == (B, F) and pred.dtype == jnp.float32
    assert bool(jnp.all(jnp.isfinite(pred)))
    print("KERNEL_OK")
</pallas_src>

<mosaic_0001>
module attributes {stable_mosaic.version = 11 : i64} {
  func.func @transformer_kernel(%arg0: memref<16x4xf32, #tpu.memory_space<vmem>>, %arg1: memref<488x128xf32, #tpu.memory_space<vmem>>, %arg2: memref<40x128xf32, #tpu.memory_space<vmem>>, %arg3: memref<2x128xf32, #tpu.memory_space<vmem>>) attributes {dimension_semantics = [], scalar_prefetch = 0 : i64, scratch_operands = 0 : i64, tpu.core_type = #tpu.core_type<tc>} {
    %c0 = arith.constant 0 : index
    %c0_0 = arith.constant 0 : index
    %0 = vector.load %arg0[%c0, %c0_0] : memref<16x4xf32, #tpu.memory_space<vmem>>, vector<16x4xf32>
    %cst = arith.constant -1.000000e+05 : f32
    %cst_1 = arith.constant 1.000000e+05 : f32
    %1 = vector.broadcast %cst : f32 to vector<16x4xf32>
    %2 = arith.maximumf %1, %0 : vector<16x4xf32>
    %3 = vector.broadcast %cst_1 : f32 to vector<16x4xf32>
    %4 = arith.minimumf %3, %2 : vector<16x4xf32>
    %c0_2 = arith.constant 0 : index
    %c0_3 = arith.constant 0 : index
    %5 = vector.load %arg1[%c0_2, %c0_3] : memref<488x128xf32, #tpu.memory_space<vmem>>, vector<4x32xf32>
    %cst_4 = arith.constant dense<0.000000e+00> : vector<16x32xf32>
    %6 = tpu.matmul %4, %5, %cst_4 {dimension_numbers = #tpu.dot_dimension_numbers<[1], [0], [0], [1], [0, 0, 1, 1], [], []>} : vector<16x4xf32>, vector<4x32xf32>, vector<16x32xf32> -> vector<16x32xf32>
    %c0_5 = arith.constant 0 : index
    %c0_6 = arith.constant 0 : index
    %7 = vector.load %arg2[%c0_5, %c0_6] : memref<40x128xf32, #tpu.memory_space<vmem>>, vector<16x32xf32>
    %8 = arith.addf %6, %7 : vector<16x32xf32>
    %c16 = arith.constant 16 : index
    %c0_7 = arith.constant 0 : index
    %9 = vector.load %arg2[%c16, %c0_7] : memref<40x128xf32, #tpu.memory_space<vmem>>, vector<1x32xf32>
    %c17 = arith.constant 17 : index
    %c0_8 = arith.constant 0 : index
    %10 = vector.load %arg2[%c17, %c0_8] : memref<40x128xf32, #tpu.memory_space<vmem>>, vector<1x32xf32>
    %cst_9 = arith.constant dense<0.000000e+00> : vector<16xf32>
    %11 = vector.multi_reduction <add>, %8, %cst_9 [1] : vector<16x32xf32> to vector<16xf32>
    %12 = vector.shape_cast %11 : vector<16xf32> to vector<16x1xf32>
    %cst_10 = arith.constant 3.200000e+01 : f32
    %13 = vector.broadcast %cst_10 : f32 to vector<16x1xf32>
    %14 = arith.divf %12, %13 : vector<16x1xf32>
    %15 = vector.broadcast %14 : vector<16x1xf32> to vector<16x32xf32>
    %16 = arith.subf %8, %15 : vector<16x32xf32>
    %17 = arith.mulf %16, %16 : vector<16x32xf32>
    %cst_11 = arith.constant dense<0.000000e+00> : vector<16xf32>
    %18 = vector.multi_reduction <add>, %17, %cst_11 [1] : vector<16x32xf32> to vector<16xf32>
    %19 = vector.shape_cast %18 : vector<16xf32> to vector<16x1xf32>
    %cst_12 = arith.constant 3.200000e+01 : f32
    %20 = vector.broadcast %cst_12 : f32 to vector<16x1xf32>
    %21 = arith.divf %19, %20 : vector<16x1xf32>
    %cst_13 = arith.constant 9.99999974E-6 : f32
    %22 = vector.broadcast %cst_13 : f32 to vector<16x1xf32>
    %23 = arith.addf %21, %22 : vector<16x1xf32>
    %24 = math.rsqrt %23 : vector<16x1xf32>
    %25 = vector.broadcast %24 : vector<16x1xf32> to vector<16x32xf32>
    %26 = arith.mulf %16, %25 : vector<16x32xf32>
    %27 = vector.broadcast %9 : vector<1x32xf32> to vector<16x32xf32>
    %28 = arith.mulf %26, %27 : vector<16x32xf32>
    %29 = vector.broadcast %10 : vector<1x32xf32> to vector<16x32xf32>
    %30 = arith.addf %28, %29 : vector<16x32xf32>
    %c8 = arith.constant 8 : index
    %c0_14 = arith.constant 0 : index
    %31 = vector.load %arg1[%c8, %c0_14] : memref<488x128xf32, #tpu.memory_space<vmem>>, vector<32x96xf32>
    %cst_15 = arith.constant dense<0.000000e+00> : vector<16x96xf32>
    %32 = tpu.matmul %30, %31, %cst_15 {dimension_numbers = #tpu.dot_dimension_numbers<[1], [0], [0], [1], [0, 0, 1, 1], [], []>} : vector<16x32xf32>, vector<32x96xf32>, vector<16x96xf32> -> vector<16x96xf32>
    %c18 = arith.constant 18 : index
    %c0_16 = arith.constant 0 : index
    %33 = vector.load %arg2[%c18, %c0_16] : memref<40x128xf32, #tpu.memory_space<vmem>>, vector<1x96xf32>
    %34 = vector.broadcast %33 : vector<1x96xf32> to vector<16x96xf32>
    %35 = arith.addf %32, %34 : vector<16x96xf32>
    %36 = vector.shape_cast %35 : vector<16x96xf32> to vector<2x8x96xf32>
    %37 = vector.extract_strided_slice %36 {offsets = [0, 0, 0], sizes = [2, 8, 24], strides = [1, 1, 1]} : vector<2x8x96xf32> to vector<2x8x24xf32>
    %38 = vector.extract_strided_slice %36 {offsets = [0, 0, 24], sizes = [2, 8, 24], strides = [1, 1, 1]} : vector<2x8x96xf32> to vector<2x8x24xf32>
    %39 = vector.extract_strided_slice %36 {offsets = [0, 0, 48], sizes = [2, 8, 24], strides = [1, 1, 1]} : vector<2x8x96xf32> to vector<2x8x24xf32>
    %40 = vector.extract_strided_slice %36 {offsets = [0, 0, 72], sizes = [2, 8, 24], strides = [1, 1, 1]} : vector<2x8x96xf32> to vector<2x8x24xf32>
    %41 = tpu.concatenate %37, %38, %39, %40 in 0 : vector<2x8x24xf32>, vector<2x8x24xf32>, vector<2x8x24xf32>, vector<2x8x24xf32> -> vector<8x8x24xf32>
    %42 = vector.extract_strided_slice %41 {offsets = [0, 0, 0], sizes = [8, 8, 8], strides = [1, 1, 1]} : vector<8x8x24xf32> to vector<8x8x8xf32>
    %43 = vector.extract_strided_slice %41 {offsets = [0, 0, 8], sizes = [8, 8, 8], strides = [1, 1, 1]} : vector<8x8x24xf32> to vector<8x8x8xf32>
    %44 = vector.extract_strided_slice %41 {offsets = [0, 0, 16], sizes = [8, 8, 8], strides = [1, 1, 1]} : vector<8x8x24xf32> to vector<8x8x8xf32>
    "tpu.trace_start"() <{level = 10 : i32, message = "bqd,bkd->bqk"}> : () -> ()
    %cst_17 = arith.constant dense<0.000000e+00> : vector<8x8x8xf32>
    %45 = tpu.matmul %42, %43, %cst_17 {dimension_numbers = #tpu.dot_dimension_numbers<[2], [2], [1], [1], [0, 0, 0, 1, 1, 1], [0], [0]>} : vector<8x8x8xf32>, vector<8x8x8xf32>, vector<8x8x8xf32> -> vector<8x8x8xf32>
    "tpu.trace_stop"() : () -> ()
    %cst_18 = arith.constant dense<0xFF800000> : vector<8x8xf32>
    %46 = vector.multi_reduction <maximumf>, %45, %cst_18 [2] : vector<8x8x8xf32> to vector<8x8xf32>
    %47 = vector.shape_cast %46 : vector<8x8xf32> to vector<8x8x1xf32>
    %48 = vector.broadcast %47 : vector<8x8x1xf32> to vector<8x8x8xf32>
    %49 = arith.subf %45, %48 : vector<8x8x8xf32>
    %50 = math.exp %49 : vector<8x8x8xf32>
    %cst_19 = arith.constant dense<0.000000e+00> : vector<8x8xf32>
    %51 = vector.multi_reduction <add>, %50, %cst_19 [2] : vector<8x8x8xf32> to vector<8x8xf32>
    %52 = vector.shape_cast %51 : vector<8x8xf32> to vector<8x8x1xf32>
    %53 = tpu.reciprocal %52 {approx = true} : vector<8x8x1xf32> -> vector<8x8x1xf32>
    %54 = vector.broadcast %53 : vector<8x8x1xf32> to vector<8x8x8xf32>
    %55 = arith.mulf %50, %54 : vector<8x8x8xf32>
    "tpu.trace_start"() <{level = 10 : i32, message = "bqk,bkd->bqd"}> : () -> ()
    %cst_20 = arith.constant dense<0.000000e+00> : vector<8x8x8xf32>
    %56 = tpu.matmul %55, %44, %cst_20 {dimension_numbers = #tpu.dot_dimension_numbers<[2], [1], [1], [2], [0, 0, 0, 1, 1, 2], [0], [0]>} : vector<8x8x8xf32>, vector<8x8x8xf32>, vector<8x8x8xf32> -> vector<8x8x8xf32>
    "tpu.trace_stop"() : () -> ()
    %57 = vector.extract_strided_slice %56 {offsets = [0, 0, 0], sizes = [2, 8, 8], strides = [1, 1, 1]} : vector<8x8x8xf32> to vector<2x8x8xf32>
    %58 = vector.extract_strided_slice %56 {offsets = [2, 0, 0], sizes = [2, 8, 8], strides = [1, 1, 1]} : vector<8x8x8xf32> to vector<2x8x8xf32>
    %59 = vector.extract_strided_slice %56 {offsets = [4, 0, 0], sizes = [2, 8, 8], strides = [1, 1, 1]} : vector<8x8x8xf32> to vector<2x8x8xf32>
    %60 = vector.extract_strided_slice %56 {offsets = [6, 0, 0], sizes = [2, 8, 8], strides = [1, 1, 1]} : vector<8x8x8xf32> to vector<2x8x8xf32>
    %61 = tpu.concatenate %57, %58, %59, %60 in 2 : vector<2x8x8xf32>, vector<2x8x8xf32>, vector<2x8x8xf32>, vector<2x8x8xf32> -> vector<2x8x32xf32>
    %62 = vector.shape_cast %61 : vector<2x8x32xf32> to vector<16x32xf32>
    %c40 = arith.constant 40 : index
    %c0_21 = arith.constant 0 : index
    %63 = vector.load %arg1[%c40, %c0_21] : memref<488x128xf32, #tpu.memory_space<vmem>>, vector<32x32xf32>
    %cst_22 = arith.constant dense<0.000000e+00> : vector<16x32xf32>
    %64 = tpu.matmul %62, %63, %cst_22 {dimension_numbers = #tpu.dot_dimension_numbers<[1], [0], [0], [1], [0, 0, 1, 1], [], []>} : vector<16x32xf32>, vector<32x32xf32>, vector<16x32xf32> -> vector<16x32xf32>
    %c19 = arith.constant 19 : index
    %c0_23 = arith.constant 0 : index
    %65 = vector.load %arg2[%c19, %c0_23] : memref<40x128xf32, #tpu.memory_space<vmem>>, vector<1x32xf32>
    %66 = vector.broadcast %65 : vector<1x32xf32> to vector<16x32xf32>
    %67 = arith.addf %64, %66 : vector<16x32xf32>
    %68 = arith.addf %8, %67 : vector<16x32xf32>
    %c20 = arith.constant 20 : index
    %c0_24 = arith.constant 0 : index
    %69 = vector.load %arg2[%c20, %c0_24] : memref<40x128xf32, #tpu.memory_space<vmem>>, vector<1x32xf32>
    %c21 = arith.constant 21 : index
    %c0_25 = arith.constant 0 : index
    %70 = vector.load %arg2[%c21, %c0_25] : memref<40x128xf32, #tpu.memory_space<vmem>>, vector<1x32xf32>
    %cst_26 = arith.constant dense<0.000000e+00> : vector<16xf32>
    %71 = vector.multi_reduction <add>, %68, %cst_26 [1] : vector<16x32xf32> to vector<16xf32>
    %72 = vector.shape_cast %71 : vector<16xf32> to vector<16x1xf32>
    %cst_27 = arith.constant 3.200000e+01 : f32
    %73 = vector.broadcast %cst_27 : f32 to vector<16x1xf32>
    %74 = arith.divf %72, %73 : vector<16x1xf32>
    %75 = vector.broadcast %74 : vector<16x1xf32> to vector<16x32xf32>
    %76 = arith.subf %68, %75 : vector<16x32xf32>
    %77 = arith.mulf %76, %76 : vector<16x32xf32>
    %cst_28 = arith.constant dense<0.000000e+00> : vector<16xf32>
    %78 = vector.multi_reduction <add>, %77, %cst_28 [1] : vector<16x32xf32> to vector<16xf32>
    %79 = vector.shape_cast %78 : vector<16xf32> to vector<16x1xf32>
    %cst_29 = arith.constant 3.200000e+01 : f32
    %80 = vector.broadcast %cst_29 : f32 to vector<16x1xf32>
    %81 = arith.divf %79, %80 : vector<16x1xf32>
    %cst_30 = arith.constant 9.99999974E-6 : f32
    %82 = vector.broadcast %cst_30 : f32 to vector<16x1xf32>
    %83 = arith.addf %81, %82 : vector<16x1xf32>
    %84 = math.rsqrt %83 : vector<16x1xf32>
    %85 = vector.broadcast %84 : vector<16x1xf32> to vector<16x32xf32>
    %86 = arith.mulf %76, %85 : vector<16x32xf32>
    %87 = vector.broadcast %69 : vector<1x32xf32> to vector<16x32xf32>
    %88 = arith.mulf %86, %87 : vector<16x32xf32>
    %89 = vector.broadcast %70 : vector<1x32xf32> to vector<16x32xf32>
    %90 = arith.addf %88, %89 : vector<16x32xf32>
    %c72 = arith.constant 72 : index
    %c0_31 = arith.constant 0 : index
    %91 = vector.load %arg1[%c72, %c0_31] : memref<488x128xf32, #tpu.memory_space<vmem>>, vector<32x128xf32>
    %cst_32 = arith.constant dense<0.000000e+00> : vector<16x128xf32>
    %92 = tpu.matmul %90, %91, %cst_32 {dimension_numbers = #tpu.dot_dimension_numbers<[1], [0], [0], [1], [0, 0, 1, 1], [], []>} : vector<16x32xf32>, vector<32x128xf32>, vector<16x128xf32> -> vector<16x128xf32>
    %c22 = arith.constant 22 : index
    %c0_33 = arith.constant 0 : index
    %93 = vector.load %arg2[%c22, %c0_33] : memref<40x128xf32, #tpu.memory_space<vmem>>, vector<1x128xf32>
    %94 = vector.broadcast %93 : vector<1x128xf32> to vector<16x128xf32>
    %95 = arith.addf %92, %94 : vector<16x128xf32>
    %cst_34 = arith.constant 0.000000e+00 : f32
    %96 = vector.broadcast %cst_34 : f32 to vector<16x128xf32>
    %97 = arith.maximumf %95, %96 : vector<16x128xf32>
    %c104 = arith.constant 104 : index
    %c0_35 = arith.constant 0 : index
    %98 = vector.load %arg1[%c104, %c0_35] : memref<488x128xf32, #tpu.memory_space<vmem>>, vector<128x32xf32>
    %cst_36 = arith.constant dense<0.000000e+00> : vector<16x32xf32>
    %99 = tpu.matmul %97, %98, %cst_36 {dimension_numbers = #tpu.dot_dimension_numbers<[1], [0], [0], [1], [0, 0, 1, 1], [], []>} : vector<16x128xf32>, vector<128x32xf32>, vector<16x32xf32> -> vector<16x32xf32>
    %c23 = arith.constant 23 : index
    %c0_37 = arith.constant 0 : index
    %100 = vector.load %arg2[%c23, %c0_37] : memref<40x128xf32, #tpu.memory_space<vmem>>, vector<1x32xf32>
    %101 = vector.broadcast %100 : vector<1x32xf32> to vector<16x32xf32>
    %102 = arith.addf %99, %101 : vector<16x32xf32>
    %103 = arith.addf %68, %102 : vector<16x32xf32>
    %c24 = arith.constant 24 : index
    %c0_38 = arith.constant 0 : index
    %104 = vector.load %arg2[%c24, %c0_38] : memref<40x128xf32, #tpu.memory_space<vmem>>, vector<1x32xf32>
    %c25 = arith.constant 25 : index
    %c0_39 = arith.constant 0 : index
    %105 = vector.load %arg2[%c25, %c0_39] : memref<40x128xf32, #tpu.memory_space<vmem>>, vector<1x32xf32>
    %cst_40 = arith.constant dense<0.000000e+00> : vector<16xf32>
    %106 = vector.multi_reduction <add>, %103, %cst_40 [1] : vector<16x32xf32> to vector<16xf32>
    %107 = vector.shape_cast %106 : vector<16xf32> to vector<16x1xf32>
    %cst_41 = arith.constant 3.200000e+01 : f32
    %108 = vector.broadcast %cst_41 : f32 to vector<16x1xf32>
    %109 = arith.divf %107, %108 : vector<16x1xf32>
    %110 = vector.broadcast %109 : vector<16x1xf32> to vector<16x32xf32>
    %111 = arith.subf %103, %110 : vector<16x32xf32>
    %112 = arith.mulf %111, %111 : vector<16x32xf32>
    %cst_42 = arith.constant dense<0.000000e+00> : vector<16xf32>
    %113 = vector.multi_reduction <add>, %112, %cst_42 [1] : vector<16x32xf32> to vector<16xf32>
    %114 = vector.shape_cast %113 : vector<16xf32> to vector<16x1xf32>
    %cst_43 = arith.constant 3.200000e+01 : f32
    %115 = vector.broadcast %cst_43 : f32 to vector<16x1xf32>
    %116 = arith.divf %114, %115 : vector<16x1xf32>
    %cst_44 = arith.constant 9.99999974E-6 : f32
    %117 = vector.broadcast %cst_44 : f32 to vector<16x1xf32>
    %118 = arith.addf %116, %117 : vector<16x1xf32>
    %119 = math.rsqrt %118 : vector<16x1xf32>
    %120 = vector.broadcast %119 : vector<16x1xf32> to vector<16x32xf32>
    %121 = arith.mulf %111, %120 : vector<16x32xf32>
    %122 = vector.broadcast %104 : vector<1x32xf32> to vector<16x32xf32>
    %123 = arith.mulf %121, %122 : vector<16x32xf32>
    %124 = vector.broadcast %105 : vector<1x32xf32> to vector<16x32xf32>
    %125 = arith.addf %123, %124 : vector<16x32xf32>
    %c232 = arith.constant 232 : index
    %c0_45 = arith.constant 0 : index
    %126 = vector.load %arg1[%c232, %c0_45] : memref<488x128xf32, #tpu.memory_space<vmem>>, vector<32x96xf32>
    %cst_46 = arith.constant dense<0.000000e+00> : vector<16x96xf32>
    %127 = tpu.matmul %125, %126, %cst_46 {dimension_numbers = #tpu.dot_dimension_numbers<[1], [0], [0], [1], [0, 0, 1, 1], [], []>} : vector<16x32xf32>, vector<32x96xf32>, vector<16x96xf32> -> vector<16x96xf32>
    %c26 = arith.constant 26 : index
    %c0_47 = arith.constant 0 : index
    %128 = vector.load %arg2[%c26, %c0_47] : memref<40x128xf32, #tpu.memory_space<vmem>>, vector<1x96xf32>
    %129 = vector.broadcast %128 : vector<1x96xf32> to vector<16x96xf32>
    %130 = arith.addf %127, %129 : vector<16x96xf32>
    %131 = vector.shape_cast %130 : vector<16x96xf32> to vector<2x8x96xf32>
    %132 = vector.extract_strided_slice %131 {offsets = [0, 0, 0], sizes = [2, 8, 24], strides = [1, 1, 1]} : vector<2x8x96xf32> to vector<2x8x24xf32>
    %133 = vector.extract_strided_slice %131 {offsets = [0, 0, 24], sizes = [2, 8, 24], strides = [1, 1, 1]} : vector<2x8x96xf32> to vector<2x8x24xf32>
    %134 = vector.extract_strided_slice %131 {offsets = [0, 0, 48], sizes = [2, 8, 24], strides = [1, 1, 1]} : vector<2x8x96xf32> to vector<2x8x24xf32>
    %135 = vector.extract_strided_slice %131 {offsets = [0, 0, 72], sizes = [2, 8, 24], strides = [1, 1, 1]} : vector<2x8x96xf32> to vector<2x8x24xf32>
    %136 = tpu.concatenate %132, %133, %134, %135 in 0 : vector<2x8x24xf32>, vector<2x8x24xf32>, vector<2x8x24xf32>, vector<2x8x24xf32> -> vector<8x8x24xf32>
    %137 = vector.extract_strided_slice %136 {offsets = [0, 0, 0], sizes = [8, 8, 8], strides = [1, 1, 1]} : vector<8x8x24xf32> to vector<8x8x8xf32>
    %138 = vector.extract_strided_slice %136 {offsets = [0, 0, 8], sizes = [8, 8, 8], strides = [1, 1, 1]} : vector<8x8x24xf32> to vector<8x8x8xf32>
    %139 = vector.extract_strided_slice %136 {offsets = [0, 0, 16], sizes = [8, 8, 8], strides = [1, 1, 1]} : vector<8x8x24xf32> to vector<8x8x8xf32>
    "tpu.trace_start"() <{level = 10 : i32, message = "bqd,bkd->bqk"}> : () -> ()
    %cst_48 = arith.constant dense<0.000000e+00> : vector<8x8x8xf32>
    %140 = tpu.matmul %137, %138, %cst_48 {dimension_numbers = #tpu.dot_dimension_numbers<[2], [2], [1], [1], [0, 0, 0, 1, 1, 1], [0], [0]>} : vector<8x8x8xf32>, vector<8x8x8xf32>, vector<8x8x8xf32> -> vector<8x8x8xf32>
    "tpu.trace_stop"() : () -> ()
    %cst_49 = arith.constant dense<0xFF800000> : vector<8x8xf32>
    %141 = vector.multi_reduction <maximumf>, %140, %cst_49 [2] : vector<8x8x8xf32> to vector<8x8xf32>
    %142 = vector.shape_cast %141 : vector<8x8xf32> to vector<8x8x1xf32>
    %143 = vector.broadcast %142 : vector<8x8x1xf32> to vector<8x8x8xf32>
    %144 = arith.subf %140, %143 : vector<8x8x8xf32>
    %145 = math.exp %144 : vector<8x8x8xf32>
    %cst_50 = arith.constant dense<0.000000e+00> : vector<8x8xf32>
    %146 = vector.multi_reduction <add>, %145, %cst_50 [2] : vector<8x8x8xf32> to vector<8x8xf32>
    %147 = vector.shape_cast %146 : vector<8x8xf32> to vector<8x8x1xf32>
    %148 = tpu.reciprocal %147 {approx = true} : vector<8x8x1xf32> -> vector<8x8x1xf32>
    %149 = vector.broadcast %148 : vector<8x8x1xf32> to vector<8x8x8xf32>
    %150 = arith.mulf %145, %149 : vector<8x8x8xf32>
    "tpu.trace_start"() <{level = 10 : i32, message = "bqk,bkd->bqd"}> : () -> ()
    %cst_51 = arith.constant dense<0.000000e+00> : vector<8x8x8xf32>
    %151 = tpu.matmul %150, %139, %cst_51 {dimension_numbers = #tpu.dot_dimension_numbers<[2], [1], [1], [2], [0, 0, 0, 1, 1, 2], [0], [0]>} : vector<8x8x8xf32>, vector<8x8x8xf32>, vector<8x8x8xf32> -> vector<8x8x8xf32>
    "tpu.trace_stop"() : () -> ()
    %152 = vector.extract_strided_slice %151 {offsets = [0, 0, 0], sizes = [2, 8, 8], strides = [1, 1, 1]} : vector<8x8x8xf32> to vector<2x8x8xf32>
    %153 = vector.extract_strided_slice %151 {offsets = [2, 0, 0], sizes = [2, 8, 8], strides = [1, 1, 1]} : vector<8x8x8xf32> to vector<2x8x8xf32>
    %154 = vector.extract_strided_slice %151 {offsets = [4, 0, 0], sizes = [2, 8, 8], strides = [1, 1, 1]} : vector<8x8x8xf32> to vector<2x8x8xf32>
    %155 = vector.extract_strided_slice %151 {offsets = [6, 0, 0], sizes = [2, 8, 8], strides = [1, 1, 1]} : vector<8x8x8xf32> to vector<2x8x8xf32>
    %156 = tpu.concatenate %152, %153, %154, %155 in 2 : vector<2x8x8xf32>, vector<2x8x8xf32>, vector<2x8x8xf32>, vector<2x8x8xf32> -> vector<2x8x32xf32>
    %157 = vector.shape_cast %156 : vector<2x8x32xf32> to vector<16x32xf32>
    %c264 = arith.constant 264 : index
    %c0_52 = arith.constant 0 : index
    %158 = vector.load %arg1[%c264, %c0_52] : memref<488x128xf32, #tpu.memory_space<vmem>>, vector<32x32xf32>
    %cst_53 = arith.constant dense<0.000000e+00> : vector<16x32xf32>
    %159 = tpu.matmul %157, %158, %cst_53 {dimension_numbers = #tpu.dot_dimension_numbers<[1], [0], [0], [1], [0, 0, 1, 1], [], []>} : vector<16x32xf32>, vector<32x32xf32>, vector<16x32xf32> -> vector<16x32xf32>
    %c27 = arith.constant 27 : index
    %c0_54 = arith.constant 0 : index
    %160 = vector.load %arg2[%c27, %c0_54] : memref<40x128xf32, #tpu.memory_space<vmem>>, vector<1x32xf32>
    %161 = vector.broadcast %160 : vector<1x32xf32> to vector<16x32xf32>
    %162 = arith.addf %159, %161 : vector<16x32xf32>
    %163 = arith.addf %103, %162 : vector<16x32xf32>
    %c28 = arith.constant 28 : index
    %c0_55 = arith.constant 0 : index
    %164 = vector.load %arg2[%c28, %c0_55] : memref<40x128xf32, #tpu.memory_space<vmem>>, vector<1x32xf32>
    %c29 = arith.constant 29 : index
    %c0_56 = arith.constant 0 : index
    %165 = vector.load %arg2[%c29, %c0_56] : memref<40x128xf32, #tpu.memory_space<vmem>>, vector<1x32xf32>
    %cst_57 = arith.constant dense<0.000000e+00> : vector<16xf32>
    %166 = vector.multi_reduction <add>, %163, %cst_57 [1] : vector<16x32xf32> to vector<16xf32>
    %167 = vector.shape_cast %166 : vector<16xf32> to vector<16x1xf32>
    %cst_58 = arith.constant 3.200000e+01 : f32
    %168 = vector.broadcast %cst_58 : f32 to vector<16x1xf32>
    %169 = arith.divf %167, %168 : vector<16x1xf32>
    %170 = vector.broadcast %169 : vector<16x1xf32> to vector<16x32xf32>
    %171 = arith.subf %163, %170 : vector<16x32xf32>
    %172 = arith.mulf %171, %171 : vector<16x32xf32>
    %cst_59 = arith.constant dense<0.000000e+00> : vector<16xf32>
    %173 = vector.multi_reduction <add>, %172, %cst_59 [1] : vector<16x32xf32> to vector<16xf32>
    %174 = vector.shape_cast %173 : vector<16xf32> to vector<16x1xf32>
    %cst_60 = arith.constant 3.200000e+01 : f32
    %175 = vector.broadcast %cst_60 : f32 to vector<16x1xf32>
    %176 = arith.divf %174, %175 : vector<16x1xf32>
    %cst_61 = arith.constant 9.99999974E-6 : f32
    %177 = vector.broadcast %cst_61 : f32 to vector<16x1xf32>
    %178 = arith.addf %176, %177 : vector<16x1xf32>
    %179 = math.rsqrt %178 : vector<16x1xf32>
    %180 = vector.broadcast %179 : vector<16x1xf32> to vector<16x32xf32>
    %181 = arith.mulf %171, %180 : vector<16x32xf32>
    %182 = vector.broadcast %164 : vector<1x32xf32> to vector<16x32xf32>
    %183 = arith.mulf %181, %182 : vector<16x32xf32>
    %184 = vector.broadcast %165 : vector<1x32xf32> to vector<16x32xf32>
    %185 = arith.addf %183, %184 : vector<16x32xf32>
    %c296 = arith.constant 296 : index
    %c0_62 = arith.constant 0 : index
    %186 = vector.load %arg1[%c296, %c0_62] : memref<488x128xf32, #tpu.memory_space<vmem>>, vector<32x128xf32>
    %cst_63 = arith.constant dense<0.000000e+00> : vector<16x128xf32>
    %187 = tpu.matmul %185, %186, %cst_63 {dimension_numbers = #tpu.dot_dimension_numbers<[1], [0], [0], [1], [0, 0, 1, 1], [], []>} : vector<16x32xf32>, vector<32x128xf32>, vector<16x128xf32> -> vector<16x128xf32>
    %c30 = arith.constant 30 : index
    %c0_64 = arith.constant 0 : index
    %188 = vector.load %arg2[%c30, %c0_64] : memref<40x128xf32, #tpu.memory_space<vmem>>, vector<1x128xf32>
    %189 = vector.broadcast %188 : vector<1x128xf32> to vector<16x128xf32>
    %190 = arith.addf %187, %189 : vector<16x128xf32>
    %cst_65 = arith.constant 0.000000e+00 : f32
    %191 = vector.broadcast %cst_65 : f32 to vector<16x128xf32>
    %192 = arith.maximumf %190, %191 : vector<16x128xf32>
    %c328 = arith.constant 328 : index
    %c0_66 = arith.constant 0 : index
    %193 = vector.load %arg1[%c328, %c0_66] : memref<488x128xf32, #tpu.memory_space<vmem>>, vector<128x32xf32>
    %cst_67 = arith.constant dense<0.000000e+00> : vector<16x32xf32>
    %194 = tpu.matmul %192, %193, %cst_67 {dimension_numbers = #tpu.dot_dimension_numbers<[1], [0], [0], [1], [0, 0, 1, 1], [], []>} : vector<16x128xf32>, vector<128x32xf32>, vector<16x32xf32> -> vector<16x32xf32>
    %c31 = arith.constant 31 : index
    %c0_68 = arith.constant 0 : index
    %195 = vector.load %arg2[%c31, %c0_68] : memref<40x128xf32, #tpu.memory_space<vmem>>, vector<1x32xf32>
    %196 = vector.broadcast %195 : vector<1x32xf32> to vector<16x32xf32>
    %197 = arith.addf %194, %196 : vector<16x32xf32>
    %198 = arith.addf %163, %197 : vector<16x32xf32>
    %199 = vector.extract_strided_slice %198 {offsets = [7, 0], sizes = [1, 32], strides = [1, 1]} : vector<16x32xf32> to vector<1x32xf32>
    %200 = vector.extract_strided_slice %198 {offsets = [15, 0], sizes = [1, 32], strides = [1, 1]} : vector<16x32xf32> to vector<1x32xf32>
    %201 = tpu.concatenate %199, %200 in 0 : vector<1x32xf32>, vector<1x32xf32> -> vector<2x32xf32>
    %c32 = arith.constant 32 : index
    %c0_69 = arith.constant 0 : index
    %202 = vector.load %arg2[%c32, %c0_69] : memref<40x128xf32, #tpu.memory_space<vmem>>, vector<1x32xf32>
    %c33 = arith.constant 33 : index
    %c0_70 = arith.constant 0 : index
    %203 = vector.load %arg2[%c33, %c0_70] : memref<40x128xf32, #tpu.memory_space<vmem>>, vector<1x32xf32>
    %cst_71 = arith.constant dense<0.000000e+00> : vector<2xf32>
    %204 = vector.multi_reduction <add>, %201, %cst_71 [1] : vector<2x32xf32> to vector<2xf32>
    %205 = vector.shape_cast %204 : vector<2xf32> to vector<2x1xf32>
    %cst_72 = arith.constant 3.200000e+01 : f32
    %206 = vector.broadcast %cst_72 : f32 to vector<2x1xf32>
    %207 = arith.divf %205, %206 : vector<2x1xf32>
    %208 = vector.broadcast %207 : vector<2x1xf32> to vector<2x32xf32>
    %209 = arith.subf %201, %208 : vector<2x32xf32>
    %210 = arith.mulf %209, %209 : vector<2x32xf32>
    %cst_73 = arith.constant dense<0.000000e+00> : vector<2xf32>
    %211 = vector.multi_reduction <add>, %210, %cst_73 [1] : vector<2x32xf32> to vector<2xf32>
    %212 = vector.shape_cast %211 : vector<2xf32> to vector<2x1xf32>
    %cst_74 = arith.constant 3.200000e+01 : f32
    %213 = vector.broadcast %cst_74 : f32 to vector<2x1xf32>
    %214 = arith.divf %212, %213 : vector<2x1xf32>
    %cst_75 = arith.constant 9.99999997E-7 : f32
    %215 = vector.broadcast %cst_75 : f32 to vector<2x1xf32>
    %216 = arith.addf %214, %215 : vector<2x1xf32>
    %217 = math.rsqrt %216 : vector<2x1xf32>
    %218 = vector.broadcast %217 : vector<2x1xf32> to vector<2x32xf32>
    %219 = arith.mulf %209, %218 : vector<2x32xf32>
    %220 = vector.broadcast %202 : vector<1x32xf32> to vector<2x32xf32>
    %221 = arith.mulf %219, %220 : vector<2x32xf32>
    %222 = vector.broadcast %203 : vector<1x32xf32> to vector<2x32xf32>
    %223 = arith.addf %221, %222 : vector<2x32xf32>
    %c456 = arith.constant 456 : index
    %c0_76 = arith.constant 0 : index
    %224 = vector.load %arg1[%c456, %c0_76] : memref<488x128xf32, #tpu.memory_space<vmem>>, vector<32x128xf32>
    %cst_77 = arith.constant dense<0.000000e+00> : vector<2x128xf32>
    %225 = tpu.matmul %223, %224, %cst_77 {dimension_numbers = #tpu.dot_dimension_numbers<[1], [0], [0], [1], [0, 0, 1, 1], [], []>} : vector<2x32xf32>, vector<32x128xf32>, vector<2x128xf32> -> vector<2x128xf32>
    %c34 = arith.constant 34 : index
    %c0_78 = arith.constant 0 : index
    %226 = vector.load %arg2[%c34, %c0_78] : memref<40x128xf32, #tpu.memory_space<vmem>>, vector<1x128xf32>
    %227 = vector.broadcast %226 : vector<1x128xf32> to vector<2x128xf32>
    %228 = arith.addf %225, %227 : vector<2x128xf32>
    %cst_79 = arith.constant -1.000000e+05 : f32
    %cst_80 = arith.constant 1.000000e+05 : f32
    %229 = vector.broadcast %cst_79 : f32 to vector<2x128xf32>
    %230 = arith.maximumf %229, %228 : vector<2x128xf32>
    %231 = vector.broadcast %cst_80 : f32 to vector<2x128xf32>
    %232 = arith.minimumf %231, %230 : vector<2x128xf32>
    %c0_81 = arith.constant 0 : index
    %c0_82 = arith.constant 0 : index
    %233 = vector.load %arg3[%c0_81, %c0_82] : memref<2x128xf32, #tpu.memory_space<vmem>>, vector<2x128xf32>
    tpu.vector_store %arg3[%c0_81, %c0_82], %232 {strides = array<i32>} : memref<2x128xf32, #tpu.memory_space<vmem>>, vector<2x128xf32>,
    return
  }
}

</mosaic_0001>

<bundles_post_ra>
// kernel: tpu_custom_call.1
= control target key start
LH: loop header
LB: loop body
LE: loop exit
PB: predicated region body
PF: predicated region fallthrough
CT: control target
= control target key end

     0   :  { %8 = vsyncpa [#allocation3], 0  ;;  %s5231_s0 = inlined_call_operand.vmem [shape: f32[16,4], index: 0, kind: input, shape index: {}]   ;;  %s5232_s1 = inlined_call_operand.hbm [shape: f32[488,128], index: 1, kind: input, shape index: {}]   ;;  %s5233_s2 = inlined_call_operand.hbm [shape: f32[40,128], index: 2, kind: input, shape index: {}]   ;;  %s5234_s3 = inlined_call_operand.hbm [shape: f32[2,128], index: 3, kind: output, shape index: {}]  }
   0x1   :  { %9 = vsyncpa [#allocation6], 0 }
   0x2   :  { %10 = vsyncpa [#allocation4], 0  ;;  %s4707_s12 = smov [#allocation2]   ;;  %s4635_s16 = scalar_lea.hbm %s5232_s1, 7808 }
   0x3   :  { %s18_s13 = sshll.u32 %s4707_s12, 4  ;;  %p4636_p0 = scmp.ne.s32.totalorder %s5232_s1, %s4635_s16  ;;  %s19_s13 = int_to_ptr.vmem [resolvable:$true] %s18_s13 }
   0x4   :  { %p4639_p1 = scmp.lt.u32.totalorder %s4635_s16, %s5232_s1 }
   0x6   :  { %p4641_p2 = pnand %p4639_p1, %p4636_p0 }
   0x8   :  { %4644 = shalt.err (!%p4641_p2)
}
   0x9   :  { %s4645_s21 = scalar_lea.vmem %s19_s13, 7808  ;;  %p4650_p4 = scmp.lt.s32.totalorder %s19_s13, %s19_s13 }
   0xa   :  { %p4646_p3 = scmp.ne.s32.totalorder %s19_s13, %s4645_s21  ;;  %p4651_p5 = scmp.lt.s32.totalorder %s4645_s21, %s4645_s21 }
   0xc   :  { %p4652_p6 = por %p4651_p5, %p4650_p4 }
   0xe   :  { %p4653_p7 = pnand %p4652_p6, %p4646_p3 }
  0x10   :  { %4656 = shalt.err (!%p4653_p7)
}
  0x11   :  { %s4708_s22 = smov 128   ;;  %s4709_s23 = smov 8  }
  0x12   :  { %24 = dma.hbm_to_vmem [thread:$0]  %s5232_s1, 7808, %s19_s13, [#allocation3], %s4708_s22, %s4708_s22, %s4709_s23  }
  0x13   :  { %s4710_s26 = smov [#allocation5]   ;;  %s4657_s30 = scalar_lea.hbm %s5233_s2, 640 }
  0x14   :  { %s30_s27 = sshll.u32 %s4710_s26, 4  ;;  %p4658_p8 = scmp.ne.s32.totalorder %s5233_s2, %s4657_s30  ;;  %s31_s27 = int_to_ptr.vmem [resolvable:$true] %s30_s27 }
  0x15   :  { %p4661_p9 = scmp.lt.u32.totalorder %s4657_s30, %s5233_s2 }
  0x17   :  { %p4663_p10 = pnand %p4661_p9, %p4658_p8 }
  0x19   :  { %4666 = shalt.err (!%p4663_p10)
}
  0x1a   :  { %s4667_s8 = scalar_lea.vmem %s31_s27, 640  ;;  %p4672_p12 = scmp.lt.s32.totalorder %s31_s27, %s31_s27 }
  0x1b   :  { %p4668_p11 = scmp.ne.s32.totalorder %s31_s27, %s4667_s8  ;;  %p4673_p13 = scmp.lt.s32.totalorder %s4667_s8, %s4667_s8 }
  0x1d   :  { %p4674_p0 = por %p4673_p13, %p4672_p12 }
  0x1f   :  { %p4675_p1 = pnand %p4674_p0, %p4668_p11 }
  0x21   :  { %4678 = shalt.err (!%p4675_p1)
}
  0x22   :  { %36 = dma.hbm_to_vmem [thread:$0]  %s5233_s2, 640, %s31_s27, [#allocation6], %s4708_s22, %s4708_s22, %s4709_s23  }
  0x23   :  { %4701 = dma.done.wait [#allocation3], 7808  }
  0x24   :  { %4702 = vsyncadd [#allocation3], 4294959488 }
  0x25   :  { %4703 = dma.done.wait [#allocation6], 640  }
  0x26   :  { %4704 = vsyncadd [#allocation6], 4294966656  ;;  %vm59_vm0 = vcmask 1043456   ;;  %v49_v0 = vld [vmem:[#allocation2] sm:$0xf]  ;;  %v43_v1 = vld [vmem:[%s5231_s0] sm:$0xff] }
  0x27   :  { %vm52_vm1 = vcmask 31744   ;;  %v44_v2 = vld [vmem:[%s5231_s0 + $0x8] sm:$0xff]  ;;  %4108 = vmatprep.subr.msk.mxu0 %vm59_vm0, %v49_v0  ;;  %v3878_v3 = vclamps-f32 %v43_v1, 100000.0  ;;  %v50_v5 = vld [vmem:[#allocation5] sm:$0xff]  ;;  %v51_v7 = vld [vmem:[#allocation5 + $0x8] sm:$0xff]  ;;  %vm140_vm2 = vcmask 261120  }
  0x28   :  { %v3879_v4 = vclamps-f32 %v44_v2, 100000.0  ;;  %4109 = vmatpush3.msk.msra.mxu0 %vm59_vm0, %v49_v0  ;;  %v180_v23 = vld [vmem:[#allocation2 + $0x8] sm:$0xff]  ;;  %v181_v24 = vld [vmem:[#allocation2 + $0x10] sm:$0xff]  ;;  %v182_v25 = vld [vmem:[#allocation2 + $0x18] sm:$0xff]  ;;  %v4711_v46 = vmov 0.0   ;;  %vm4712_vm3 = vmmov 0  }
  0x29   :  { %4110 = vmatprep.mubr.msk.f32.mxu0 %vm52_vm1, %v3878_v3  ;;  %v4420_v26 = vpack.c.bf16 %v181_v24, %v180_v23  ;;  %v183_v27 = vld [vmem:[#allocation2 + $0x20] sm:$0xff]  ;;  %v3883_v36 = vld [vmem:[#allocation5 + $0x10] ss:$0 sm:$0xff]  ;;  %v3884_v38 = vld [vmem:[#allocation5 + $0x11] ss:$0 sm:$0xff]  ;;  %4144 = vmatprep.subr.mxu1 %v4711_v46  ;;  %s4713_s0 = smov 104  }
  0x2a   :  { %4111 = vmatmul.mubr.msk.f32.vlgmr.msra.gmra.mrb[0].mxu0 %vm52_vm1, %v3879_v4  ;;  %v4424_v28 = vpack.c.bf16 %v183_v27, %v182_v25  ;;  %v3885_v45 = vld [vmem:[#allocation5 + $0x12] ss:$0 sm:$0xff]  ;;  %4146 = vmatprep.mubr.msk.f32.mxu1 %vm4712_vm3, %v4711_v46  ;;  %s4714_s2 = smov 80   ;;  %s4715_s14 = smov 56   ;;  %vm286_vm4 = vcmask 64512   ;;  %vm1615_vm5 = vcmask 130048  }
  0x2b   :  { %4421 = vmatprep.subr.bf16.mxu0 %v4420_v26  ;;  %s4716_s15 = smov 120   ;;  %s4717_s16 = smov 112   ;;  %vm1618_vm6 = vcmask 195584   ;;  %vm3749_vm7 = vcmask 1040384   ;;  %vm3753_vm8 = vcmask 254976  }
  0x2c   :  { %4423 = vmatpush3.bf16.msra.mxu0 %v4420_v26  ;;  %s4718_s17 = smov 16   ;;  %s4719_s18 = smov 24  }
  0x2d   :  { %4425 = vmatprep.subr.bf16.mxu0 %v4424_v28  ;;  %s4721_s19 = smov [#allocation7]  }
  0x2e   :  { %s3868_s20 = sshll.u32 %s4721_s19, 4  ;;  %s3869_s20 = int_to_ptr.vmem [resolvable:$true] %s3868_s20 }
  0x2f   :  { %s4679_s21 = scalar_lea.vmem %s3869_s20, 32  ;;  %p4684_p3 = scmp.lt.s32.totalorder %s3869_s20, %s3869_s20 }
  0x30   :  { %4427 = vmatpush3.bf16.msra.mxu0 %v4424_v28  ;;  %p4680_p2 = scmp.ne.s32.totalorder %s3869_s20, %s4679_s21  ;;  %p4685_p4 = scmp.lt.s32.totalorder %s4679_s21, %s4679_s21 }
  0x31   :  { %4124 = vmatprep.subr.mxu0 %v4711_v46 }
  0x32   :  { %p4686_p5 = por %p4685_p4, %p4684_p3 }
  0x34   :  { %p4687_p6 = pnand %p4686_p5, %p4680_p2 }
  0xfd   :  { %v4112_v6 = vpop.f32.mrb[0].mxu0 }
  0xfe   :  { %v129_v8 = vpop.f32.mrb[1].mxu0  ;;  %v4776_v10 = vadd.f32 %v4112_v6, %v51_v7 }
  0xff   :  { %v4774_v9 = vadd.f32 %v129_v8, %v50_v5 }
 0x100   :  { %v144_v12 = vsel %vm140_vm2, %v4776_v10, 0.0 }
 0x101   :  { %v141_v11 = vsel %vm140_vm2, %v4774_v9, 0.0 }
 0x102   :  { %142 = vadd.xlane.f32.xlu0 %v141_v11 }
 0x106   :  { %145 = vadd.xlane.f32.xlu0 %v144_v12 }
 0x18f   :  { %v143_v13 = vpop.xlane.xlu0 %142 }
 0x190   :  { %v148_v14 = vmul.f32 0.03125, %v143_v13 }
 0x192   :  { %v150_v15 = vsub.f32 %v4774_v9, %v148_v14 }
 0x193   :  { %v146_v16 = vpop.xlane.xlu0 %145 }
 0x194   :  { %v149_v17 = vmul.f32 0.03125, %v146_v16  ;;  %v152_v18 = vmul.f32 %v150_v15, %v150_v15 }
 0x196   :  { %v151_v19 = vsub.f32 %v4776_v10, %v149_v17  ;;  %v154_v20 = vsel %vm140_vm2, %v152_v18, 0.0 }
 0x197   :  { %155 = vadd.xlane.f32.xlu1 %v154_v20 }
 0x198   :  { %v153_v21 = vmul.f32 %v151_v19, %v151_v19 }
 0x19a   :  { %v157_v22 = vsel %vm140_vm2, %v153_v21, 0.0 }
 0x19b   :  { %158 = vadd.xlane.f32.xlu1 %v157_v22 }
 0x224   :  { %v156_v29 = vpop.xlane.xlu1 %155 }
 0x225   :  { %v160_v30 = vmul.f32 0.03125, %v156_v29 }
 0x227   :  { %v162_v31 = vadd.f32 1e-05, %v160_v30 }
 0x228   :  { %v159_v32 = vpop.xlane.xlu1 %158 }
 0x229   :  { %4553 = vrsqrt.f32 %v162_v31  ;;  %v161_v33 = vmul.f32 0.03125, %v159_v32 }
 0x22b   :  { %v163_v34 = vadd.f32 1e-05, %v161_v33 }
 0x22d   :  { %4555 = vrsqrt.f32 %v163_v34 }
 0x233   :  { %v4554_v35 = vpop.eup %4553 }
 0x234   :  { %v166_v37 = vmul.f32 %v4554_v35, %v150_v15 }
 0x236   :  { %v172_v39 = vmul.f32 %v3883_v36, %v166_v37 }
 0x237   :  { %v4556_v40 = vpop.eup %4555 }
 0x238   :  { %v167_v41 = vmul.f32 %v4556_v40, %v151_v19  ;;  %v178_v42 = vadd.f32 %v3884_v38, %v172_v39 }
 0x23a   :  { %v173_v43 = vmul.f32 %v3883_v36, %v167_v41  ;;  %4121 = vmatprep.mubr.msk.f32.mxu0 %vm140_vm2, %v178_v42 }
 0x23c   :  { %v179_v44 = vadd.f32 %v3884_v38, %v173_v43 }
 0x23e   :  { %4122 = vmatmul.mubr.msk.f32.vlgmr.msra.gmra.mrb[2].mxu0 %vm140_vm2, %v179_v44 }
 0x23f   :  { %4126 = vmatprep.mubr.msk.f32.mxu0 %vm4712_vm3, %v4711_v46 }
 0x311   :  { %v4123_v47 = vpop.f32.mrb[2].mxu0 }
 0x312   :  { %v4794_v48 = vadd.f32 %v4123_v47, %v3885_v45  ;;  %v261_v49 = vpop.f32.mrb[3].mxu0 }
 0x313   :  { %v4796_v50 = vadd.f32 %v3885_v45, %v261_v49 }
 0x314   :  { %274 = vrot.lane.b32.xlu1 %v4794_v48, %s4713_s0 }
 0x315   :  { %272 = vrot.lane.b32.xlu0 %v4796_v50, %s4713_s0 }
 0x318   :  { %276 = vrot.lane.b32.xlu1 %v4796_v50, %s4714_s2 }
 0x319   :  { %280 = vrot.lane.b32.xlu0 %v4796_v50, %s4715_s14 }
 0x31c   :  { %278 = vrot.lane.b32.xlu1 %v4794_v48, %s4714_s2 }
 0x31d   :  { %284 = vrot.lane.b32.xlu0 %v4796_v50, %s4716_s15 }
 0x320   :  { %282 = vrot.lane.b32.xlu1 %v4794_v48, %s4715_s14 }
 0x324   :  { %361 = vrot.lane.b32.xlu1 %v4794_v48, %s4716_s15 }
 0x386   :  { %v4814_v51 = vpop.permute.xlu1 %274 }
 0x387   :  { %513 = vrot.lane.b32.xlu1 %v4814_v51, %s4716_s15  ;;  %v4818_v52 = vpop.permute.xlu0 %272 }
 0x388   :  { %437 = vrot.lane.b32.xlu0 %v4818_v52, %s4716_s15 }
 0x38a   :  { %v4822_v53 = vpop.permute.xlu1 %276 }
 0x38b   :  { %v4824_v54 = vpop.permute.xlu0 %280 }
 0x38c   :  { %589 = vrot.lane.b32.xlu0 %v4822_v53, %s4716_s15 }
 0x38e   :  { %v4828_v55 = vpop.permute.xlu1 %278 }
 0x38f   :  { %665 = vrot.lane.b32.xlu1 %v4828_v55, %s4716_s15  ;;  %v285_v56 = vpop.permute.xlu0 %284 }
 0x390   :  { %741 = vrot.lane.b32.xlu0 %v4824_v54, %s4716_s15  ;;  %4125 = vmatpush3.xpose.msk.msra.mxu0 %vm286_vm4, %v285_v56 }
 0x391   :  { %4129 = vmatprep.subr.mxu0 %v4711_v46 }
 0x392   :  { %v4836_v57 = vpop.permute.xlu1 %282 }
 0x393   :  { %817 = vrot.lane.b32.xlu1 %v4836_v57, %s4716_s15  ;;  %4127 = vmatmul.mubr.msk.f32.vlgmr.msra.gmra.mrb[4].mxu0 %vm286_vm4, %v4796_v50 }
 0x394   :  { %4131 = vmatprep.mubr.msk.f32.mxu0 %vm4712_vm3, %v4711_v46 }
 0x396   :  { %v362_v58 = vpop.permute.xlu1 %361 }
 0x397   :  { %4130 = vmatpush3.xpose.msk.msra.mxu0 %vm286_vm4, %v362_v58 }
 0x398   :  { %4134 = vmatprep.subr.mxu0 %v4711_v46 }
 0x39a   :  { %4132 = vmatmul.mubr.msk.f32.vlgmr.msra.gmra.mrb[6].mxu0 %vm286_vm4, %v4794_v48 }
 0x39b   :  { %4136 = vmatprep.mubr.msk.f32.mxu0 %vm4712_vm3, %v4711_v46 }
 0x3f9   :  { %v514_v60 = vpop.permute.xlu1 %513 }
 0x3fa   :  { %v438_v59 = vpop.permute.xlu0 %437 }
 0x3fb   :  { %4135 = vmatpush3.xpose.msk.msra.mxu0 %vm286_vm4, %v438_v59 }
 0x3fc   :  { %4139 = vmatprep.subr.mxu0 %v4711_v46 }
 0x3fe   :  { %4137 = vmatmul.mubr.msk.f32.vlgmr.msra.gmra.mrb[8].mxu0 %vm286_vm4, %v4818_v52  ;;  %v590_v61 = vpop.permute.xlu0 %589 }
 0x3ff   :  { %4140 = vmatpush3.xpose.msk.msra.mxu0 %vm286_vm4, %v514_v60  ;;  %4145 = vmatpush3.xpose.msk.msra.mxu1 %vm286_vm4, %v590_v61 }
 0x400   :  { %4141 = vmatprep.mubr.msk.f32.mxu0 %vm4712_vm3, %v4711_v46  ;;  %4149 = vmatprep.subr.mxu0 %v4711_v46 }
 0x401   :  { %v666_v62 = vpop.permute.xlu1 %665  ;;  %4154 = vmatprep.subr.mxu1 %v4711_v46 }
 0x402   :  { %4142 = vmatmul.mubr.msk.f32.vlgmr.msra.gmra.mrb[10].mxu0 %vm286_vm4, %v4814_v51  ;;  %4147 = vmatmul.mubr.msk.f32.vlgmr.msra.gmra.mrb[0].mxu1 %vm286_vm4, %v4822_v53  ;;  %v742_v63 = vpop.permute.xlu0 %741 }
 0x403   :  { %4150 = vmatpush3.xpose.msk.msra.mxu0 %vm286_vm4, %v666_v62  ;;  %4155 = vmatpush3.xpose.msk.msra.mxu1 %vm286_vm4, %v742_v63 }
 0x404   :  { %4151 = vmatprep.mubr.msk.f32.mxu0 %vm4712_vm3, %v4711_v46  ;;  %4156 = vmatprep.mubr.msk.f32.mxu1 %vm4712_vm3, %v4711_v46 }
 0x405   :  { %v818_v0 = vpop.permute.xlu1 %817  ;;  %4159 = vmatprep.subr.mxu0 %v4711_v46  ;;  %4164 = vmatprep.subr.mxu1 %v4711_v46 }
 0x406   :  { %4152 = vmatmul.mubr.msk.f32.vlgmr.msra.gmra.mrb[12].mxu0 %vm286_vm4, %v4828_v55  ;;  %4157 = vmatmul.mubr.msk.f32.vlgmr.msra.gmra.mrb[2].mxu1 %vm286_vm4, %v4824_v54 }
 0x407   :  { %4160 = vmatpush3.xpose.msk.msra.mxu0 %vm286_vm4, %v818_v0  ;;  %4161 = vmatprep.mubr.msk.f32.mxu0 %vm4712_vm3, %v4711_v46 }
 0x408   :  { %4169 = vmatprep.subr.mxu0 %v4711_v46  ;;  %4166 = vmatprep.mubr.msk.f32.mxu1 %vm4712_vm3, %v4711_v46 }
 0x40a   :  { %4162 = vmatmul.mubr.msk.f32.vlgmr.msra.gmra.mrb[14].mxu0 %vm286_vm4, %v4836_v57 }
 0x40b   :  { %4171 = vmatprep.mubr.msk.f32.mxu0 %vm4712_vm3, %v4711_v46 }
 0x466   :  { %v357_v1 = vpop.f32.mrb[4].mxu0 }
 0x467   :  { %v4128_v2 = vpop.f32.mrb[5].mxu0  ;;  %v893_v3 = vsel %vm286_vm4, %v357_v1, -inf }
 0x468   :  { %894 = vmax.xlane.f32.xlu0 %v893_v3 }
 0x46d   :  { %v433_v4 = vpop.f32.mrb[6].mxu0 }
 0x46e   :  { %v4133_v5 = vpop.f32.mrb[7].mxu0  ;;  %v896_v6 = vsel %vm286_vm4, %v433_v4, -inf }
 0x46f   :  { %897 = vmax.xlane.f32.xlu1 %v896_v6 }
 0x4d1   :  { %v509_v7 = vpop.f32.mrb[8].mxu0 }
 0x4d2   :  { %v4138_v8 = vpop.f32.mrb[9].mxu0  ;;  %v899_v11 = vsel %vm286_vm4, %v509_v7, -inf }
 0x4d3   :  { %900 = vmax.xlane.f32.xlu0 %v899_v11 }
 0x4d5   :  { %v585_v12 = vpop.f32.mrb[10].mxu0  ;;  %v661_v13 = vpop.f32.mrb[0].mxu1 }
 0x4d6   :  { %v4143_v14 = vpop.f32.mrb[11].mxu0  ;;  %v4148_v15 = vpop.f32.mrb[1].mxu1  ;;  %v902_v16 = vsel %vm286_vm4, %v585_v12, -inf  ;;  %v905_v22 = vsel %vm286_vm4, %v661_v13, -inf }
 0x4d7   :  { %903 = vmax.xlane.f32.xlu0 %v902_v16 }
 0x4d9   :  { %v737_v17 = vpop.f32.mrb[12].mxu0  ;;  %v813_v18 = vpop.f32.mrb[2].mxu1 }
 0x4da   :  { %v4153_v19 = vpop.f32.mrb[13].mxu0  ;;  %v4158_v20 = vpop.f32.mrb[3].mxu1  ;;  %v908_v21 = vsel %vm286_vm4, %v737_v17, -inf  ;;  %v911_v26 = vsel %vm286_vm4, %v813_v18, -inf }
 0x4db   :  { %909 = vmax.xlane.f32.xlu1 %v908_v21  ;;  %906 = vmax.xlane.f32.xlu0 %v905_v22 }
 0x4dd   :  { %v889_v23 = vpop.f32.mrb[14].mxu0 }
 0x4de   :  { %v4163_v24 = vpop.f32.mrb[15].mxu0  ;;  %v914_v25 = vsel %vm286_vm4, %v889_v23, -inf }
 0x4df   :  { %915 = vmax.xlane.f32.xlu1 %v914_v25  ;;  %912 = vmax.xlane.f32.xlu0 %v911_v26 }
 0x4f0   :  { %1057 = vrot.lane.b32.xlu1 %v4794_v48, %s4717_s16 }
 0x4f4   :  { %1133 = vrot.lane.b32.xlu1 %v4818_v52, %s4717_s16 }
 0x4f5   :  { %981 = vrot.lane.b32.xlu0 %v4796_v50, %s4717_s16  ;;  %v895_v27 = vpop.xlane.xlu0 %894 }
 0x4f6   :  { %v917_v28 = vsub.f32 %v357_v1, %v895_v27 }
 0x4f8   :  { %1209 = vrot.lane.b32.xlu1 %v4814_v51, %s4717_s16  ;;  %v925_v29 = vmul.f32 1.442695, %v917_v28 }
 0x4f9   :  { %1285 = vrot.lane.b32.xlu0 %v4822_v53, %s4717_s16 }
 0x4fa   :  { %4557 = vpow2.f32 %v925_v29 }
 0x4fc   :  { %1361 = vrot.lane.b32.xlu1 %v4828_v55, %s4717_s16  ;;  %v898_v30 = vpop.xlane.xlu1 %897 }
 0x4fd   :  { %v918_v31 = vsub.f32 %v433_v4, %v898_v30 }
 0x4ff   :  { %v927_v32 = vmul.f32 1.442695, %v918_v31 }
 0x501   :  { %4559 = vpow2.f32 %v927_v32 }
 0x504   :  { %v4906_v33 = vpop.eup %4557 }
 0x505   :  { %v941_v34 = vsel %vm286_vm4, %v4906_v33, 0.0 }
 0x50b   :  { %v4910_v35 = vpop.eup %4559 }
 0x50c   :  { %v944_v36 = vsel %vm286_vm4, %v4910_v35, 0.0 }
 0x518   :  { %942 = vadd.xlane.f32.xlu0 %v941_v34 }
 0x520   :  { %945 = vadd.xlane.f32.xlu1 %v944_v36 }
 0x560   :  { %v901_v37 = vpop.xlane.xlu0 %900 }
 0x561   :  { %v919_v38 = vsub.f32 %v509_v7, %v901_v37 }
 0x563   :  { %v929_v39 = vmul.f32 1.442695, %v919_v38 }
 0x564   :  { %v904_v40 = vpop.xlane.xlu0 %903 }
 0x565   :  { %4561 = vpow2.f32 %v929_v39  ;;  %v920_v41 = vsub.f32 %v585_v12, %v904_v40 }
 0x567   :  { %v931_v42 = vmul.f32 1.442695, %v920_v41 }
 0x568   :  { %v910_v43 = vpop.xlane.xlu1 %909  ;;  %v907_v44 = vpop.xlane.xlu0 %906 }
 0x569   :  { %4563 = vpow2.f32 %v931_v42  ;;  %v922_v45 = vsub.f32 %v737_v17, %v910_v43  ;;  %v921_v47 = vsub.f32 %v661_v13, %v907_v44  ;;  %v1621_v42 = vld [vmem:[#allocation2 + $0x28] sm:$0xff]  ;;  %v1622_v43 = vld [vmem:[#allocation2 + $0x30] sm:$0xff] }
 0x56a   :  { %v4428_v44 = vpack.c.bf16 %v1622_v43, %v1621_v42  ;;  %v1851_v43 = vld [vmem:[#allocation2 + $0x98] sm:$0xff] }
 0x56b   :  { %v935_v48 = vmul.f32 1.442695, %v922_v45  ;;  %v933_v49 = vmul.f32 1.442695, %v921_v47  ;;  %v1623_v45 = vld [vmem:[#allocation2 + $0x38] sm:$0xff]  ;;  %v1624_v47 = vld [vmem:[#allocation2 + $0x40] sm:$0xff] }
 0x56c   :  { %v916_v50 = vpop.xlane.xlu1 %915  ;;  %v913_v51 = vpop.xlane.xlu0 %912 }
 0x56d   :  { %4565 = vpow2.f32 %v935_v48  ;;  %v924_v52 = vsub.f32 %v889_v23, %v916_v50  ;;  %v923_v53 = vsub.f32 %v813_v18, %v913_v51  ;;  %v4432_v48 = vpack.c.bf16 %v1624_v47, %v1623_v45  ;;  %v1853_v47 = vld [vmem:[#allocation2 + $0xa8] sm:$0xff] }
 0x56e   :  { %4567 = vpow2.f32 %v933_v49 }
 0x56f   :  { %v4562_v55 = vpop.eup %4561  ;;  %v939_v56 = vmul.f32 1.442695, %v924_v52  ;;  %v937_v58 = vmul.f32 1.442695, %v923_v53 }
 0x570   :  { %v1058_v59 = vpop.permute.xlu1 %1057  ;;  %v982_v60 = vpop.permute.xlu0 %981  ;;  %v947_v61 = vsel %vm286_vm4, %v4562_v55, 0.0 }
 0x571   :  { %4569 = vpow2.f32 %v939_v56  ;;  %4170 = vmatpush3.msra.mxu0 %v1058_v59  ;;  %948 = vadd.xlane.f32.xlu0 %v947_v61 }
 0x572   :  { %4571 = vpow2.f32 %v937_v58  ;;  %4165 = vmatpush3.msra.mxu1 %v982_v60  ;;  %4179 = vmatprep.subr.mxu0 %v4711_v46 }
 0x573   :  { %v4564_v62 = vpop.eup %4563  ;;  %4174 = vmatprep.subr.mxu1 %v4711_v46 }
 0x574   :  { %v950_v63 = vsel %vm286_vm4, %v4564_v62, 0.0  ;;  %v1134_v8 = vpop.permute.xlu1 %1133  ;;  %v1286_v11 = vpop.permute.xlu0 %1285 }
 0x575   :  { %951 = vadd.xlane.f32.xlu1 %v950_v63 }
 0x577   :  { %v4566_v0 = vpop.eup %4565 }
 0x578   :  { %v4568_v1 = vpop.eup %4567  ;;  %v956_v2 = vsel %vm286_vm4, %v4566_v0, 0.0  ;;  %v1210_v12 = vpop.permute.xlu1 %1209 }
 0x579   :  { %957 = vadd.xlane.f32.xlu1 %v956_v2  ;;  %v953_v3 = vsel %vm286_vm4, %v4568_v1, 0.0 }
 0x57a   :  { %954 = vadd.xlane.f32.xlu0 %v953_v3 }
 0x57b   :  { %v4920_v4 = vpop.eup %4569 }
 0x57c   :  { %v4922_v5 = vpop.eup %4571  ;;  %v962_v6 = vsel %vm286_vm4, %v4920_v4, 0.0  ;;  %v1362_v14 = vpop.permute.xlu1 %1361 }
 0x57d   :  { %963 = vadd.xlane.f32.xlu1 %v962_v6  ;;  %v959_v7 = vsel %vm286_vm4, %v4922_v5, 0.0 }
 0x57e   :  { %960 = vadd.xlane.f32.xlu0 %v959_v7 }
 0x58e   :  { %1513 = vrot.lane.b32.xlu1 %v4836_v57, %s4717_s16 }
 0x594   :  { %1437 = vrot.lane.b32.xlu0 %v4824_v54, %s4717_s16 }
 0x5a5   :  { %v943_v13 = vpop.xlane.xlu0 %942 }
 0x5a6   :  { %4573 = vrcp.f32 %v943_v13  ;;  %v3912_v13 = vld [vmem:[#allocation5 + $0x13] ss:$0 sm:$0xff] }
 0x5ad   :  { %v946_v15 = vpop.xlane.xlu1 %945 }
 0x5ae   :  { %4575 = vrcp.f32 %v946_v15 }
 0x5b0   :  { %v4574_v16 = vpop.eup %4573 }
 0x5b1   :  { %v973_v17 = vmul.f32 %v4574_v16, %v4906_v33 }
 0x5b3   :  { %4167 = vmatmul.mubr.msk.f32.vlgmr.msra.gmra.mrb[4].mxu1 %vm286_vm4, %v973_v17 }
 0x5b4   :  { %4175 = vmatpush3.msra.mxu1 %v1134_v8  ;;  %4176 = vmatprep.mubr.msk.f32.mxu1 %vm4712_vm3, %v4711_v46 }
 0x5b5   :  { %4184 = vmatprep.subr.mxu1 %v4711_v46 }
 0x5b8   :  { %v4576_v54 = vpop.eup %4575 }
 0x5b9   :  { %v974_v57 = vmul.f32 %v4576_v54, %v4910_v35 }
 0x5bb   :  { %4172 = vmatmul.mubr.msk.f32.vlgmr.msra.gmra.mrb[16].mxu0 %vm286_vm4, %v974_v57 }
 0x5bc   :  { %4180 = vmatpush3.msra.mxu0 %v1210_v12  ;;  %4181 = vmatprep.mubr.msk.f32.mxu0 %vm4712_vm3, %v4711_v46 }
 0x5bd   :  { %4189 = vmatprep.subr.mxu0 %v4711_v46 }
 0x5fe   :  { %v949_v18 = vpop.xlane.xlu0 %948 }
 0x5ff   :  { %4577 = vrcp.f32 %v949_v18 }
 0x602   :  { %v952_v19 = vpop.xlane.xlu1 %951 }
 0x603   :  { %4579 = vrcp.f32 %v952_v19 }
 0x606   :  { %v958_v20 = vpop.xlane.xlu1 %957 }
 0x607   :  { %4581 = vrcp.f32 %v958_v20  ;;  %v955_v21 = vpop.xlane.xlu0 %954 }
 0x608   :  { %4583 = vrcp.f32 %v955_v21 }
 0x609   :  { %v4578_v22 = vpop.eup %4577 }
 0x60a   :  { %v975_v23 = vmul.f32 %v4578_v22, %v4562_v55  ;;  %v964_v24 = vpop.xlane.xlu1 %963 }
 0x60b   :  { %4585 = vrcp.f32 %v964_v24  ;;  %v961_v25 = vpop.xlane.xlu0 %960 }
 0x60c   :  { %4587 = vrcp.f32 %v961_v25  ;;  %4177 = vmatmul.mubr.msk.f32.vlgmr.msra.gmra.mrb[6].mxu1 %vm286_vm4, %v975_v23 }
 0x60d   :  { %v4580_v26 = vpop.eup %4579  ;;  %4185 = vmatpush3.msra.mxu1 %v1286_v11  ;;  %4186 = vmatprep.mubr.msk.f32.mxu1 %vm4712_vm3, %v4711_v46 }
 0x60e   :  { %v976_v27 = vmul.f32 %v4580_v26, %v4564_v62  ;;  %4194 = vmatprep.subr.mxu1 %v4711_v46  ;;  %v1514_v32 = vpop.permute.xlu1 %1513 }
 0x60f   :  { %v1438_v34 = vpop.permute.xlu0 %1437 }
 0x610   :  { %4182 = vmatmul.mubr.msk.f32.vlgmr.msra.gmra.mrb[18].mxu0 %vm286_vm4, %v976_v27 }
 0x611   :  { %v4582_v28 = vpop.eup %4581  ;;  %4190 = vmatpush3.msra.mxu0 %v1362_v14  ;;  %4191 = vmatprep.mubr.msk.f32.mxu0 %vm4712_vm3, %v4711_v46 }
 0x612   :  { %v4584_v29 = vpop.eup %4583  ;;  %v978_v30 = vmul.f32 %v4582_v28, %v4566_v0  ;;  %4199 = vmatprep.subr.mxu0 %v4711_v46  ;;  %v1753_v28 = vld [vmem:[#allocation2 + $0x48] sm:$0xff] }
 0x613   :  { %v977_v31 = vmul.f32 %v4584_v29, %v4568_v1  ;;  %v1754_v29 = vld [vmem:[#allocation2 + $0x50] sm:$0xff] }
 0x614   :  { %4192 = vmatmul.mubr.msk.f32.vlgmr.msra.gmra.mrb[20].mxu0 %vm286_vm4, %v978_v30  ;;  %v4436_v30 = vpack.c.bf16 %v1754_v29, %v1753_v28 }
 0x615   :  { %v4586_v33 = vpop.eup %4585  ;;  %4187 = vmatmul.mubr.msk.f32.vlgmr.msra.gmra.mrb[8].mxu1 %vm286_vm4, %v977_v31  ;;  %4200 = vmatpush3.msra.mxu0 %v1514_v32  ;;  %v1755_v31 = vld [vmem:[#allocation2 + $0x58] sm:$0xff]  ;;  %v1756_v32 = vld [vmem:[#allocation2 + $0x60] sm:$0xff] }
 0x616   :  { %v4588_v35 = vpop.eup %4587  ;;  %v980_v36 = vmul.f32 %v4586_v33, %v4920_v4  ;;  %4195 = vmatpush3.msra.mxu1 %v1438_v34  ;;  %4196 = vmatprep.mubr.msk.f32.mxu1 %vm4712_vm3, %v4711_v46  ;;  %v4440_v33 = vpack.c.bf16 %v1756_v32, %v1755_v31  ;;  %v1845_v34 = vld [vmem:[#allocation2 + $0x68] sm:$0xff] }
 0x617   :  { %v979_v37 = vmul.f32 %v4588_v35, %v4922_v5  ;;  %4201 = vmatprep.mubr.msk.f32.mxu0 %vm4712_vm3, %v4711_v46  ;;  %4429 = vmatprep.subr.bf16.mxu1 %v4428_v44  ;;  %v1846_v35 = vld [vmem:[#allocation2 + $0x70] sm:$0xff] }
 0x618   :  { %4202 = vmatmul.mubr.msk.f32.vlgmr.msra.gmra.mrb[22].mxu0 %vm286_vm4, %v980_v36  ;;  %4437 = vmatprep.subr.bf16.mxu0 %v4436_v30  ;;  %v1847_v36 = vld [vmem:[#allocation2 + $0x78] sm:$0xff] }
 0x619   :  { %4197 = vmatmul.mubr.msk.f32.vlgmr.msra.gmra.mrb[10].mxu1 %vm286_vm4, %v979_v37  ;;  %4439 = vmatpush3.bf16.msra.mxu0 %v4436_v30  ;;  %v4444_v37 = vpack.c.bf16 %v1846_v35, %v1845_v34 }
 0x61a   :  { %4431 = vmatpush3.bf16.msra.mxu1 %v4428_v44  ;;  %4441 = vmatprep.subr.bf16.mxu0 %v4440_v33  ;;  %v1852_v44 = vld [vmem:[#allocation2 + $0xa0] sm:$0xff] }
 0x61b   :  { %4433 = vmatprep.subr.bf16.mxu1 %v4432_v48  ;;  %v4456_v45 = vpack.c.bf16 %v1852_v44, %v1851_v43 }
 0x61d   :  { %4443 = vmatpush3.bf16.msra.mxu0 %v4440_v33 }
 0x61e   :  { %4435 = vmatpush3.bf16.msra.mxu1 %v4432_v48  ;;  %v1854_v48 = vld [vmem:[#allocation2 + $0xb0] sm:$0xff] }
 0x61f   :  { %4445 = vmatprep.subr.bf16.mxu1 %v4444_v37 }
 0x686   :  { %v1053_v38 = vpop.f32.mrb[4].mxu1 }
 0x687   :  { %v4168_v39 = vpop.f32.mrb[5].mxu1 }
 0x68e   :  { %v1129_v40 = vpop.f32.mrb[16].mxu0 }
 0x68f   :  { %v4173_v41 = vpop.f32.mrb[17].mxu0 }
 0x690   :  { %v1850_v41 = vld [vmem:[#allocation2 + $0x90] sm:$0xff] }
 0x6df   :  { %v1205_v49 = vpop.f32.mrb[6].mxu1 }
 0x6e0   :  { %1591 = vrot.lane.b32.xlu0 %v1205_v49, %s4709_s23  ;;  %v4178_v50 = vpop.f32.mrb[7].mxu1  ;;  %v4460_v49 = vpack.c.bf16 %v1854_v48, %v1853_v47 }
 0x6e1   :  { %v1855_v50 = vld [vmem:[#allocation2 + $0xb8] sm:$0xff] }
 0x6e3   :  { %v1281_v51 = vpop.f32.mrb[18].mxu0 }
 0x6e4   :  { %1593 = vrot.lane.b32.xlu1 %v1281_v51, %s4709_s23  ;;  %v4183_v52 = vpop.f32.mrb[19].mxu0  ;;  %v1856_v51 = vld [vmem:[#allocation2 + $0xc0] sm:$0xff] }
 0x6e5   :  { %v4464_v52 = vpack.c.bf16 %v1856_v51, %v1855_v50  ;;  %v3921_v51 = vld [vmem:[#allocation5 + $0x18] ss:$0 sm:$0xff] }
 0x6e7   :  { %v1433_v53 = vpop.f32.mrb[20].mxu0 }
 0x6e8   :  { %v1357_v55 = vpop.f32.mrb[8].mxu1  ;;  %1601 = vrot.lane.b32.xlu1 %v1433_v53, %s4718_s17  ;;  %v4193_v56 = vpop.f32.mrb[21].mxu0  ;;  %v1857_v53 = vld [vmem:[#allocation2 + $0xc8] sm:$0xff] }
 0x6e9   :  { %1599 = vrot.lane.b32.xlu0 %v1357_v55, %s4718_s17  ;;  %v4188_v58 = vpop.f32.mrb[9].mxu1  ;;  %v1858_v55 = vld [vmem:[#allocation2 + $0xd0] sm:$0xff] }
 0x6ea   :  { %v4468_v56 = vpack.c.bf16 %v1858_v55, %v1857_v53 }
 0x6eb   :  { %v1585_v59 = vpop.f32.mrb[22].mxu0 }
 0x6ec   :  { %v1509_v60 = vpop.f32.mrb[10].mxu1  ;;  %1609 = vrot.lane.b32.xlu1 %v1585_v59, %s4719_s18  ;;  %v4203_v61 = vpop.f32.mrb[23].mxu0 }
 0x6ed   :  { %1607 = vrot.lane.b32.xlu0 %v1509_v60, %s4719_s18  ;;  %v4198_v62 = vpop.f32.mrb[11].mxu1 }
 0x752   :  { %v1592_v0 = vpop.permute.xlu0 %1591 }
 0x753   :  { %v1613_v4 = vsel %vm286_vm4, %v1053_v38, %v1592_v0  ;;  %v1848_v38 = vld [vmem:[#allocation2 + $0x80] sm:$0xff] }
 0x754   :  { %v4448_v39 = vpack.c.bf16 %v1848_v38, %v1847_v36  ;;  %v1984_v38 = vld [vmem:[#allocation2 + $0xf0] sm:$0xff] }
 0x756   :  { %v1594_v63 = vpop.permute.xlu1 %1593 }
 0x757   :  { %v1614_v3 = vsel %vm286_vm4, %v1129_v40, %v1594_v63  ;;  %v1849_v40 = vld [vmem:[#allocation2 + $0x88] sm:$0xff] }
 0x758   :  { %v4452_v42 = vpack.c.bf16 %v1850_v41, %v1849_v40  ;;  %v1985_v40 = vld [vmem:[#allocation2 + $0xf8] sm:$0xff]  ;;  %v1986_v41 = vld [vmem:[#allocation2 + $0x100] sm:$0xff] }
 0x75a   :  { %v1602_v1 = vpop.permute.xlu1 %1601 }
 0x75b   :  { %v1600_v2 = vpop.permute.xlu0 %1599  ;;  %v1617_v5 = vsel %vm1615_vm5, %v1614_v3, %v1602_v1  ;;  %v3915_v1 = vld [vmem:[#allocation5 + $0x14] ss:$0 sm:$0xff]  ;;  %v3916_v3 = vld [vmem:[#allocation5 + $0x15] ss:$0 sm:$0xff] }
 0x75c   :  { %v1616_v7 = vsel %vm1615_vm5, %v1613_v4, %v1600_v2 }
 0x75e   :  { %v1610_v6 = vpop.permute.xlu1 %1609 }
 0x75f   :  { %v1620_v8 = vsel %vm1618_vm6, %v1617_v5, %v1610_v6  ;;  %v1608_v11 = vpop.permute.xlu0 %1607 }
 0x760   :  { %v1619_v12 = vsel %vm1618_vm6, %v1616_v7, %v1608_v11 }
 0x761   :  { %4212 = vmatprep.mubr.msk.f32.mxu1 %vm140_vm2, %v1619_v12  ;;  %v1859_v12 = vld [vmem:[#allocation2 + $0xd8] sm:$0xff] }
 0x762   :  { %4213 = vmatmul.mubr.msk.f32.vlgmr.msra.gmra.mrb[12].mxu1 %vm140_vm2, %v1620_v8 }
 0x763   :  { %4447 = vmatpush3.bf16.msra.mxu1 %v4444_v37  ;;  %v1983_v37 = vld [vmem:[#allocation2 + $0xe8] sm:$0xff] }
 0x764   :  { %4449 = vmatprep.subr.bf16.mxu1 %v4448_v39 }
 0x767   :  { %4451 = vmatpush3.bf16.msra.mxu1 %v4448_v39  ;;  %v4476_v39 = vpack.c.bf16 %v1984_v38, %v1983_v37 }
 0x768   :  { %4453 = vmatprep.subr.bf16.mxu1 %v4452_v42 }
 0x769   :  { %4477 = vmatprep.subr.bf16.mxu0 %v4476_v39 }
 0x76b   :  { %4455 = vmatpush3.bf16.msra.mxu1 %v4452_v42  ;;  %v4480_v42 = vpack.c.bf16 %v1986_v41, %v1985_v40 }
 0x76c   :  { %4457 = vmatprep.subr.bf16.mxu1 %v4456_v45 }
 0x76f   :  { %4459 = vmatpush3.bf16.msra.mxu1 %v4456_v45 }
 0x770   :  { %4461 = vmatprep.subr.bf16.mxu1 %v4460_v49 }
 0x773   :  { %4463 = vmatpush3.bf16.msra.mxu1 %v4460_v49 }
 0x774   :  { %4465 = vmatprep.subr.bf16.mxu1 %v4464_v52 }
 0x777   :  { %4467 = vmatpush3.bf16.msra.mxu1 %v4464_v52 }
 0x778   :  { %4469 = vmatprep.subr.bf16.mxu1 %v4468_v56 }
 0x77b   :  { %4471 = vmatpush3.bf16.msra.mxu1 %v4468_v56  ;;  %v3922_v56 = vld [vmem:[#allocation5 + $0x19] ss:$0 sm:$0xff] }
 0x835   :  { %v4214_v14 = vpop.f32.mrb[12].mxu1 }
 0x836   :  { %v1708_v15 = vadd.f32 %v4214_v14, %v3912_v13  ;;  %v1702_v16 = vpop.f32.mrb[13].mxu1 }
 0x837   :  { %v1703_v17 = vadd.f32 %v3912_v13, %v1702_v16  ;;  %v1860_v13 = vld [vmem:[#allocation2 + $0xe0] sm:$0xff] }
 0x838   :  { %v4975_v54 = vadd.f32 %v1708_v15, %v4776_v10  ;;  %v4472_v14 = vpack.c.bf16 %v1860_v13, %v1859_v12  ;;  %v3917_v15 = vld [vmem:[#allocation5 + $0x16] ss:$0 sm:$0xff] }
 0x839   :  { %v4978_v57 = vadd.f32 %v1703_v17, %v4774_v9 }
 0x83a   :  { %v1718_v18 = vsel %vm140_vm2, %v4975_v54, 0.0  ;;  %4473 = vmatprep.subr.bf16.mxu1 %v4472_v14 }
 0x83b   :  { %1719 = vadd.xlane.f32.xlu1 %v1718_v18  ;;  %v1715_v19 = vsel %vm140_vm2, %v4978_v57, 0.0  ;;  %4475 = vmatpush3.bf16.msra.mxu1 %v4472_v14 }
 0x83c   :  { %1716 = vadd.xlane.f32.xlu0 %v1715_v19  ;;  %4302 = vmatprep.subr.mxu1 %v4711_v46 }
 0x8c8   :  { %v1720_v20 = vpop.xlane.xlu1 %1719 }
 0x8c9   :  { %v1722_v21 = vmul.f32 0.03125, %v1720_v20  ;;  %v1717_v22 = vpop.xlane.xlu0 %1716 }
 0x8ca   :  { %v1721_v23 = vmul.f32 0.03125, %v1717_v22  ;;  %v3920_v22 = vld [vmem:[#allocation5 + $0x17] ss:$0 sm:$0xff] }
 0x8cb   :  { %v4985_v24 = vsub.f32 %v4975_v54, %v1722_v21 }
 0x8cc   :  { %v1723_v10 = vsub.f32 %v4978_v57, %v1721_v23 }
 0x8cd   :  { %v1726_v26 = vmul.f32 %v4985_v24, %v4985_v24 }
 0x8ce   :  { %v1725_v25 = vmul.f32 %v1723_v10, %v1723_v10 }
 0x8cf   :  { %v1730_v27 = vsel %vm140_vm2, %v1726_v26, 0.0 }
 0x8d0   :  { %v1727_v9 = vsel %vm140_vm2, %v1725_v25, 0.0 }
 0x8d1   :  { %1728 = vadd.xlane.f32.xlu0 %v1727_v9 }
 0x8d5   :  { %1731 = vadd.xlane.f32.xlu0 %v1730_v27 }
 0x95e   :  { %v1729_v58 = vpop.xlane.xlu0 %1728 }
 0x95f   :  { %v1733_v59 = vmul.f32 0.03125, %v1729_v58 }
 0x961   :  { %v1735_v60 = vadd.f32 1e-05, %v1733_v59 }
 0x962   :  { %v1732_v61 = vpop.xlane.xlu0 %1731 }
 0x963   :  { %4589 = vrsqrt.f32 %v1735_v60  ;;  %v1734_v62 = vmul.f32 0.03125, %v1732_v61 }
 0x965   :  { %v1736_v63 = vadd.f32 1e-05, %v1734_v62  ;;  %v3923_v62 = vld [vmem:[#allocation5 + $0x1a] ss:$0 sm:$0xff] }
 0x967   :  { %4591 = vrsqrt.f32 %v1736_v63 }
 0x96d   :  { %v4590_v0 = vpop.eup %4589 }
 0x96e   :  { %v1739_v2 = vmul.f32 %v4590_v0, %v1723_v10 }
 0x970   :  { %v1745_v4 = vmul.f32 %v3915_v1, %v1739_v2 }
 0x971   :  { %v4592_v5 = vpop.eup %4591 }
 0x972   :  { %v1740_v6 = vmul.f32 %v4592_v5, %v4985_v24  ;;  %v1751_v7 = vadd.f32 %v3916_v3, %v1745_v4 }
 0x974   :  { %v1746_v8 = vmul.f32 %v3915_v1, %v1740_v6  ;;  %4223 = vmatprep.mubr.msk.f32.mxu0 %vm140_vm2, %v1751_v7 }
 0x976   :  { %v1752_v11 = vadd.f32 %v3916_v3, %v1746_v8 }
 0x978   :  { %4224 = vmatmul.mubr.msk.f32.vlgmr.msra.gmra.mrb[24].mxu0 %vm140_vm2, %v1752_v11 }
 0x979   :  { %4479 = vmatpush3.bf16.msra.mxu0 %v4476_v39 }
 0x97a   :  { %4481 = vmatprep.subr.bf16.mxu0 %v4480_v42 }
 0x97d   :  { %4483 = vmatpush3.bf16.msra.mxu0 %v4480_v42 }
 0x97e   :  { %4272 = vmatprep.subr.mxu0 %v4711_v46 }
 0xa4b   :  { %v4225_v16 = vpop.f32.mrb[24].mxu0 }
 0xa4c   :  { %v1840_v17 = vadd.f32 %v4225_v16, %v3917_v15  ;;  %v1834_v18 = vpop.f32.mrb[25].mxu0 }
 0xa4d   :  { %v1835_v19 = vadd.f32 %v3917_v15, %v1834_v18 }
 0xa4e   :  { %v1844_v21 = vmax.f32 %v1840_v17, 0.0 }
 0xa4f   :  { %v1843_v20 = vmax.f32 %v1835_v19, 0.0 }
 0xa51   :  { %4258 = vmatprep.mubr.f32.mxu1 %v1843_v20 }
 0xa52   :  { %4259 = vmatmul.mubr.f32.vlgmr.msra.gmra.mrb[14].mxu1 %v1844_v21 }
 0xa53   :  { %4304 = vmatprep.mubr.msk.f32.mxu1 %vm4712_vm3, %v4711_v46 }
 0xb25   :  { %v4260_v23 = vpop.f32.mrb[14].mxu1 }
 0xb26   :  { %v1938_v24 = vadd.f32 %v4260_v23, %v3920_v22  ;;  %v1932_v10 = vpop.f32.mrb[15].mxu1 }
 0xb27   :  { %v1933_v25 = vadd.f32 %v3920_v22, %v1932_v10 }
 0xb28   :  { %v4999_v9 = vadd.f32 %v1938_v24, %v4975_v54 }
 0xb29   :  { %v5002_v26 = vadd.f32 %v1933_v25, %v4978_v57 }
 0xb2a   :  { %v1948_v27 = vsel %vm140_vm2, %v4999_v9, 0.0 }
 0xb2b   :  { %1949 = vadd.xlane.f32.xlu1 %v1948_v27  ;;  %v1945_v28 = vsel %vm140_vm2, %v5002_v26, 0.0 }
 0xb2c   :  { %1946 = vadd.xlane.f32.xlu0 %v1945_v28 }
 0xbb8   :  { %v1950_v29 = vpop.xlane.xlu1 %1949 }
 0xbb9   :  { %v1952_v30 = vmul.f32 0.03125, %v1950_v29  ;;  %v1947_v31 = vpop.xlane.xlu0 %1946 }
 0xbba   :  { %v1951_v32 = vmul.f32 0.03125, %v1947_v31 }
 0xbbb   :  { %v1954_v33 = vsub.f32 %v4999_v9, %v1952_v30 }
 0xbbc   :  { %v1953_v54 = vsub.f32 %v5002_v26, %v1951_v32 }
 0xbbd   :  { %v1956_v34 = vmul.f32 %v1954_v33, %v1954_v33 }
 0xbbe   :  { %v1955_v35 = vmul.f32 %v1953_v54, %v1953_v54 }
 0xbbf   :  { %v1960_v57 = vsel %vm140_vm2, %v1956_v34, 0.0 }
 0xbc0   :  { %1961 = vadd.xlane.f32.xlu1 %v1960_v57  ;;  %v1957_v36 = vsel %vm140_vm2, %v1955_v35, 0.0 }
 0xbc1   :  { %1958 = vadd.xlane.f32.xlu0 %v1957_v36 }
 0xc4d   :  { %v1962_v43 = vpop.xlane.xlu1 %1961 }
 0xc4e   :  { %v1964_v44 = vmul.f32 0.03125, %v1962_v43  ;;  %v1959_v45 = vpop.xlane.xlu0 %1958 }
 0xc4f   :  { %v1963_v47 = vmul.f32 0.03125, %v1959_v45 }
 0xc50   :  { %v1966_v48 = vadd.f32 1e-05, %v1964_v44 }
 0xc51   :  { %v1965_v49 = vadd.f32 1e-05, %v1963_v47 }
 0xc52   :  { %4593 = vrsqrt.f32 %v1966_v48 }
 0xc53   :  { %4595 = vrsqrt.f32 %v1965_v49 }
 0xc5c   :  { %v4594_v50 = vpop.eup %4593 }
 0xc5d   :  { %v4596_v52 = vpop.eup %4595  ;;  %v1970_v53 = vmul.f32 %v4594_v50, %v1954_v33 }
 0xc5e   :  { %v1969_v55 = vmul.f32 %v4596_v52, %v1953_v54 }
 0xc5f   :  { %v1976_v58 = vmul.f32 %v3921_v51, %v1970_v53 }
 0xc60   :  { %v1975_v59 = vmul.f32 %v3921_v51, %v1969_v55 }
 0xc61   :  { %v1982_v61 = vadd.f32 %v3922_v56, %v1976_v58 }
 0xc62   :  { %v1981_v60 = vadd.f32 %v3922_v56, %v1975_v59 }
 0xc64   :  { %4269 = vmatprep.mubr.msk.f32.mxu0 %vm140_vm2, %v1981_v60 }
 0xc65   :  { %4270 = vmatmul.mubr.msk.f32.vlgmr.msra.gmra.mrb[26].mxu0 %vm140_vm2, %v1982_v61 }
 0xc66   :  { %4274 = vmatprep.mubr.msk.f32.mxu0 %vm4712_vm3, %v4711_v46 }
 0xd38   :  { %v4271_v63 = vpop.f32.mrb[26].mxu0 }
 0xd39   :  { %v5017_v0 = vadd.f32 %v4271_v63, %v3923_v62  ;;  %v2064_v1 = vpop.f32.mrb[27].mxu0 }
 0xd3a   :  { %v5019_v2 = vadd.f32 %v3923_v62, %v2064_v1 }
 0xd3b   :  { %2077 = vrot.lane.b32.xlu1 %v5017_v0, %s4713_s0 }
 0xd3c   :  { %2075 = vrot.lane.b32.xlu0 %v5019_v2, %s4713_s0 }
 0xd3f   :  { %2079 = vrot.lane.b32.xlu1 %v5019_v2, %s4714_s2 }
 0xd40   :  { %2083 = vrot.lane.b32.xlu0 %v5019_v2, %s4715_s14 }
 0xd43   :  { %2081 = vrot.lane.b32.xlu1 %v5017_v0, %s4714_s2 }
 0xd44   :  { %2087 = vrot.lane.b32.xlu0 %v5019_v2, %s4716_s15 }
 0xd47   :  { %2085 = vrot.lane.b32.xlu1 %v5017_v0, %s4715_s14 }
 0xd4b   :  { %2163 = vrot.lane.b32.xlu1 %v5017_v0, %s4716_s15 }
 0xdad   :  { %v5037_v3 = vpop.permute.xlu1 %2077 }
 0xdae   :  { %2315 = vrot.lane.b32.xlu1 %v5037_v3, %s4716_s15  ;;  %v5041_v4 = vpop.permute.xlu0 %2075 }
 0xdaf   :  { %2239 = vrot.lane.b32.xlu0 %v5041_v4, %s4716_s15 }
 0xdb1   :  { %v5045_v5 = vpop.permute.xlu1 %2079 }
 0xdb2   :  { %v5047_v6 = vpop.permute.xlu0 %2083 }
 0xdb3   :  { %2391 = vrot.lane.b32.xlu0 %v5045_v5, %s4716_s15 }
 0xdb5   :  { %v5051_v7 = vpop.permute.xlu1 %2081 }
 0xdb6   :  { %2467 = vrot.lane.b32.xlu1 %v5051_v7, %s4716_s15  ;;  %v2088_v8 = vpop.permute.xlu0 %2087 }
 0xdb7   :  { %2543 = vrot.lane.b32.xlu0 %v5047_v6, %s4716_s15  ;;  %4273 = vmatpush3.xpose.msk.msra.mxu0 %vm286_vm4, %v2088_v8 }
 0xdb8   :  { %4277 = vmatprep.subr.mxu0 %v4711_v46 }
 0xdb9   :  { %v5059_v11 = vpop.permute.xlu1 %2085 }
 0xdba   :  { %2619 = vrot.lane.b32.xlu1 %v5059_v11, %s4716_s15  ;;  %4275 = vmatmul.mubr.msk.f32.vlgmr.msra.gmra.mrb[28].mxu0 %vm286_vm4, %v5019_v2 }
 0xdbb   :  { %4279 = vmatprep.mubr.msk.f32.mxu0 %vm4712_vm3, %v4711_v46 }
 0xdbd   :  { %v2164_v12 = vpop.permute.xlu1 %2163 }
 0xdbe   :  { %4278 = vmatpush3.xpose.msk.msra.mxu0 %vm286_vm4, %v2164_v12 }
 0xdbf   :  { %4282 = vmatprep.subr.mxu0 %v4711_v46 }
 0xdc1   :  { %4280 = vmatmul.mubr.msk.f32.vlgmr.msra.gmra.mrb[30].mxu0 %vm286_vm4, %v5017_v0 }
 0xdc2   :  { %4284 = vmatprep.mubr.msk.f32.mxu0 %vm4712_vm3, %v4711_v46 }
 0xe20   :  { %v2316_v14 = vpop.permute.xlu1 %2315 }
 0xe21   :  { %v2240_v13 = vpop.permute.xlu0 %2239 }
 0xe22   :  { %4283 = vmatpush3.xpose.msk.msra.mxu0 %vm286_vm4, %v2240_v13 }
 0xe23   :  { %4287 = vmatprep.subr.mxu0 %v4711_v46 }
 0xe25   :  { %4285 = vmatmul.mubr.msk.f32.vlgmr.msra.gmra.mrb[32].mxu0 %vm286_vm4, %v5041_v4  ;;  %v2392_v15 = vpop.permute.xlu0 %2391 }
 0xe26   :  { %4288 = vmatpush3.xpose.msk.msra.mxu0 %vm286_vm4, %v2316_v14  ;;  %4289 = vmatprep.mubr.msk.f32.mxu0 %vm4712_vm3, %v4711_v46 }
 0xe27   :  { %4292 = vmatprep.subr.mxu0 %v4711_v46 }
 0xe28   :  { %v2468_v17 = vpop.permute.xlu1 %2467 }
 0xe29   :  { %4290 = vmatmul.mubr.msk.f32.vlgmr.msra.gmra.mrb[34].mxu0 %vm286_vm4, %v5037_v3  ;;  %v2544_v16 = vpop.permute.xlu0 %2543 }
 0xe2a   :  { %4293 = vmatpush3.xpose.msk.msra.mxu0 %vm286_vm4, %v2392_v15  ;;  %4303 = vmatpush3.xpose.msk.msra.mxu1 %vm286_vm4, %v2544_v16 }
 0xe2b   :  { %4294 = vmatprep.mubr.msk.f32.mxu0 %vm4712_vm3, %v4711_v46  ;;  %4297 = vmatprep.subr.mxu0 %v4711_v46 }
 0xe2c   :  { %4312 = vmatprep.subr.mxu1 %v4711_v46  ;;  %v2620_v18 = vpop.permute.xlu1 %2619 }
 0xe2d   :  { %4295 = vmatmul.mubr.msk.f32.vlgmr.msra.gmra.mrb[36].mxu0 %vm286_vm4, %v5045_v5  ;;  %4305 = vmatmul.mubr.msk.f32.vlgmr.msra.gmra.mrb[16].mxu1 %vm286_vm4, %v5047_v6 }
 0xe2e   :  { %4298 = vmatpush3.xpose.msk.msra.mxu0 %vm286_vm4, %v2468_v17  ;;  %4299 = vmatprep.mubr.msk.f32.mxu0 %vm4712_vm3, %v4711_v46 }
 0xe2f   :  { %4307 = vmatprep.subr.mxu0 %v4711_v46  ;;  %4314 = vmatprep.mubr.msk.f32.mxu1 %vm4712_vm3, %v4711_v46 }
 0xe31   :  { %4300 = vmatmul.mubr.msk.f32.vlgmr.msra.gmra.mrb[38].mxu0 %vm286_vm4, %v5051_v7 }
 0xe32   :  { %4308 = vmatpush3.xpose.msk.msra.mxu0 %vm286_vm4, %v2620_v18  ;;  %4309 = vmatprep.mubr.msk.f32.mxu0 %vm4712_vm3, %v4711_v46 }
 0xe33   :  { %4317 = vmatprep.subr.mxu0 %v4711_v46 }
 0xe35   :  { %4310 = vmatmul.mubr.msk.f32.vlgmr.msra.gmra.mrb[40].mxu0 %vm286_vm4, %v5059_v11 }
 0xe36   :  { %4319 = vmatprep.mubr.msk.f32.mxu0 %vm4712_vm3, %v4711_v46 }
 0xe8d   :  { %v2159_v19 = vpop.f32.mrb[28].mxu0 }
 0xe8e   :  { %v4276_v20 = vpop.f32.mrb[29].mxu0  ;;  %v2695_v21 = vsel %vm286_vm4, %v2159_v19, -inf }
 0xe8f   :  { %2696 = vmax.xlane.f32.xlu0 %v2695_v21 }
 0xe94   :  { %v2235_v22 = vpop.f32.mrb[30].mxu0 }
 0xe95   :  { %v4281_v23 = vpop.f32.mrb[31].mxu0  ;;  %v2698_v24 = vsel %vm286_vm4, %v2235_v22, -inf }
 0xe96   :  { %2699 = vmax.xlane.f32.xlu1 %v2698_v24 }
 0xef8   :  { %v2311_v10 = vpop.f32.mrb[32].mxu0 }
 0xef9   :  { %v4286_v25 = vpop.f32.mrb[33].mxu0  ;;  %v2701_v27 = vsel %vm286_vm4, %v2311_v10, -inf }
 0xefa   :  { %2702 = vmax.xlane.f32.xlu0 %v2701_v27 }
 0xefc   :  { %v2387_v28 = vpop.f32.mrb[34].mxu0 }
 0xefd   :  { %v4291_v29 = vpop.f32.mrb[35].mxu0  ;;  %v2704_v30 = vsel %vm286_vm4, %v2387_v28, -inf }
 0xefe   :  { %2705 = vmax.xlane.f32.xlu0 %v2704_v30 }
 0xf00   :  { %v2463_v31 = vpop.f32.mrb[36].mxu0  ;;  %v2615_v32 = vpop.f32.mrb[16].mxu1 }
 0xf01   :  { %v4296_v33 = vpop.f32.mrb[37].mxu0  ;;  %v4306_v54 = vpop.f32.mrb[17].mxu1  ;;  %v2707_v34 = vsel %vm286_vm4, %v2463_v31, -inf  ;;  %v2713_v37 = vsel %vm286_vm4, %v2615_v32, -inf }
 0xf02   :  { %2708 = vmax.xlane.f32.xlu0 %v2707_v34 }
 0xf04   :  { %v2539_v35 = vpop.f32.mrb[38].mxu0 }
 0xf05   :  { %v4301_v57 = vpop.f32.mrb[39].mxu0  ;;  %v2710_v36 = vsel %vm286_vm4, %v2539_v35, -inf }
 0xf06   :  { %2711 = vmax.xlane.f32.xlu1 %v2710_v36  ;;  %2714 = vmax.xlane.f32.xlu0 %v2713_v37 }
 0xf08   :  { %v2691_v38 = vpop.f32.mrb[40].mxu0 }
 0xf09   :  { %v4311_v39 = vpop.f32.mrb[41].mxu0  ;;  %v2716_v40 = vsel %vm286_vm4, %v2691_v38, -inf }
 0xf0a   :  { %2717 = vmax.xlane.f32.xlu1 %v2716_v40 }
 0xf1b   :  { %2859 = vrot.lane.b32.xlu1 %v5017_v0, %s4717_s16 }
 0xf1c   :  { %2783 = vrot.lane.b32.xlu0 %v5019_v2, %s4717_s16  ;;  %v2697_v41 = vpop.xlane.xlu0 %2696 }
 0xf1d   :  { %v2719_v42 = vsub.f32 %v2159_v19, %v2697_v41 }
 0xf1f   :  { %2935 = vrot.lane.b32.xlu1 %v5041_v4, %s4717_s16  ;;  %v2727_v43 = vmul.f32 1.442695, %v2719_v42 }
 0xf20   :  { %3087 = vrot.lane.b32.xlu0 %v5045_v5, %s4717_s16 }
 0xf21   :  { %4597 = vpow2.f32 %v2727_v43 }
 0xf23   :  { %3011 = vrot.lane.b32.xlu1 %v5037_v3, %s4717_s16  ;;  %v2700_v44 = vpop.xlane.xlu1 %2699 }
 0xf24   :  { %v2720_v45 = vsub.f32 %v2235_v22, %v2700_v44 }
 0xf26   :  { %v2729_v47 = vmul.f32 1.442695, %v2720_v45 }
 0xf27   :  { %3163 = vrot.lane.b32.xlu1 %v5051_v7, %s4717_s16 }
 0xf28   :  { %4599 = vpow2.f32 %v2729_v47 }
 0xf2b   :  { %v5129_v48 = vpop.eup %4597 }
 0xf2c   :  { %v2743_v49 = vsel %vm286_vm4, %v5129_v48, 0.0 }
 0xf32   :  { %v5133_v50 = vpop.eup %4599 }
 0xf33   :  { %v2746_v51 = vsel %vm286_vm4, %v5133_v50, 0.0 }
 0xf3f   :  { %2744 = vadd.xlane.f32.xlu0 %v2743_v49 }
 0xf4b   :  { %2747 = vadd.xlane.f32.xlu1 %v2746_v51 }
 0xf87   :  { %v2703_v52 = vpop.xlane.xlu0 %2702 }
 0xf88   :  { %v2721_v53 = vsub.f32 %v2311_v10, %v2703_v52 }
 0xf8a   :  { %v2731_v55 = vmul.f32 1.442695, %v2721_v53 }
 0xf8b   :  { %v2706_v56 = vpop.xlane.xlu0 %2705 }
 0xf8c   :  { %4601 = vpow2.f32 %v2731_v55  ;;  %v2722_v58 = vsub.f32 %v2387_v28, %v2706_v56 }
 0xf8e   :  { %v2733_v59 = vmul.f32 1.442695, %v2722_v58 }
 0xf8f   :  { %v2709_v60 = vpop.xlane.xlu0 %2708 }
 0xf90   :  { %4603 = vpow2.f32 %v2733_v59  ;;  %v2723_v61 = vsub.f32 %v2463_v31, %v2709_v60  ;;  %v3421_v60 = vld [vmem:[#allocation2 + $0x108] sm:$0xff] }
 0xf92   :  { %v2735_v5 = vmul.f32 1.442695, %v2723_v61  ;;  %v3422_v61 = vld [vmem:[#allocation2 + $0x110] sm:$0xff] }
 0xf93   :  { %v2712_v62 = vpop.xlane.xlu1 %2711  ;;  %v2715_v63 = vpop.xlane.xlu0 %2714 }
 0xf94   :  { %v2724_v0 = vsub.f32 %v2539_v35, %v2712_v62  ;;  %v2725_v1 = vsub.f32 %v2615_v32, %v2715_v63  ;;  %v4484_v63 = vpack.c.bf16 %v3422_v61, %v3421_v60  ;;  %v3651_v60 = vld [vmem:[#allocation2 + $0x178] sm:$0xff]  ;;  %v3652_v61 = vld [vmem:[#allocation2 + $0x180] sm:$0xff] }
 0xf96   :  { %v4602_v2 = vpop.eup %4601  ;;  %v2737_v3 = vmul.f32 1.442695, %v2724_v0  ;;  %v2739_v4 = vmul.f32 1.442695, %v2725_v1 }
 0xf97   :  { %v2718_v7 = vpop.xlane.xlu1 %2717  ;;  %v2784_v8 = vpop.permute.xlu0 %2783  ;;  %v2749_v12 = vsel %vm286_vm4, %v4602_v2, 0.0 }
 0xf98   :  { %4605 = vpow2.f32 %v2737_v3  ;;  %v2726_v13 = vsub.f32 %v2691_v38, %v2718_v7  ;;  %2750 = vadd.xlane.f32.xlu0 %v2749_v12  ;;  %4313 = vmatpush3.msra.mxu1 %v2784_v8  ;;  %v3424_v3 = vld [vmem:[#allocation2 + $0x120] sm:$0xff] }
 0xf99   :  { %4607 = vpow2.f32 %v2739_v4  ;;  %4322 = vmatprep.subr.mxu1 %v4711_v46 }
 0xf9a   :  { %v4604_v14 = vpop.eup %4603  ;;  %v2741_v15 = vmul.f32 1.442695, %v2726_v13  ;;  %4609 = vpow2.f32 %v2735_v5 }
 0xf9b   :  { %v2860_v16 = vpop.permute.xlu1 %2859  ;;  %v2752_v17 = vsel %vm286_vm4, %v4604_v14, 0.0  ;;  %v3088_v25 = vpop.permute.xlu0 %3087 }
 0xf9c   :  { %4611 = vpow2.f32 %v2741_v15  ;;  %4318 = vmatpush3.msra.mxu0 %v2860_v16  ;;  %2753 = vadd.xlane.f32.xlu1 %v2752_v17 }
 0xf9d   :  { %4327 = vmatprep.subr.mxu0 %v4711_v46 }
 0xf9f   :  { %v2936_v27 = vpop.permute.xlu1 %2935 }
 0xfa2   :  { %v4606_v18 = vpop.eup %4605 }
 0xfa3   :  { %v5141_v19 = vpop.eup %4607  ;;  %v2758_v20 = vsel %vm286_vm4, %v4606_v18, 0.0  ;;  %v3012_v29 = vpop.permute.xlu1 %3011 }
 0xfa4   :  { %2759 = vadd.xlane.f32.xlu1 %v2758_v20  ;;  %v2761_v21 = vsel %vm286_vm4, %v5141_v19, 0.0  ;;  %v4610_v22 = vpop.eup %4609 }
 0xfa5   :  { %2762 = vadd.xlane.f32.xlu0 %v2761_v21  ;;  %v2755_v10 = vsel %vm286_vm4, %v4610_v22, 0.0 }
 0xfa6   :  { %v4612_v23 = vpop.eup %4611 }
 0xfa7   :  { %v2764_v24 = vsel %vm286_vm4, %v4612_v23, 0.0  ;;  %v3164_v30 = vpop.permute.xlu1 %3163 }
 0xfa8   :  { %2765 = vadd.xlane.f32.xlu1 %v2764_v24 }
 0xfa9   :  { %2756 = vadd.xlane.f32.xlu0 %v2755_v10 }
 0xfb9   :  { %3315 = vrot.lane.b32.xlu1 %v5059_v11, %s4717_s16 }
 0xfbf   :  { %3239 = vrot.lane.b32.xlu0 %v5047_v6, %s4717_s16 }
 0xfcc   :  { %v2745_v28 = vpop.xlane.xlu0 %2744 }
 0xfcd   :  { %4613 = vrcp.f32 %v2745_v28 }
 0xfd7   :  { %v4614_v31 = vpop.eup %4613 }
 0xfd8   :  { %v2775_v32 = vmul.f32 %v4614_v31, %v5129_v48  ;;  %v2748_v33 = vpop.xlane.xlu1 %2747 }
 0xfd9   :  { %4615 = vrcp.f32 %v2748_v33 }
 0xfda   :  { %4315 = vmatmul.mubr.msk.f32.vlgmr.msra.gmra.mrb[18].mxu1 %vm286_vm4, %v2775_v32 }
 0xfdb   :  { %4323 = vmatpush3.msra.mxu1 %v2936_v27  ;;  %4324 = vmatprep.mubr.msk.f32.mxu1 %vm4712_vm3, %v4711_v46 }
 0xfdc   :  { %4332 = vmatprep.subr.mxu1 %v4711_v46 }
 0xfe3   :  { %v4616_v6 = vpop.eup %4615 }
 0xfe4   :  { %v2776_v11 = vmul.f32 %v4616_v6, %v5133_v50 }
 0xfe6   :  { %4320 = vmatmul.mubr.msk.f32.vlgmr.msra.gmra.mrb[42].mxu0 %vm286_vm4, %v2776_v11 }
 0xfe7   :  { %4328 = vmatpush3.msra.mxu0 %v3012_v29  ;;  %4329 = vmatprep.mubr.msk.f32.mxu0 %vm4712_vm3, %v4711_v46  ;;  %v3950_v29 = vld [vmem:[#allocation5 + $0x1b] ss:$0 sm:$0xff] }
 0xfe8   :  { %4337 = vmatprep.subr.mxu0 %v4711_v46 }
0x1025   :  { %v2751_v54 = vpop.xlane.xlu0 %2750 }
0x1026   :  { %4617 = vrcp.f32 %v2751_v54 }
0x1029   :  { %v2754_v34 = vpop.xlane.xlu1 %2753 }
0x102a   :  { %4619 = vrcp.f32 %v2754_v34 }
0x1030   :  { %v4618_v35 = vpop.eup %4617 }
0x1031   :  { %v2777_v57 = vmul.f32 %v4618_v35, %v4602_v2  ;;  %v2760_v36 = vpop.xlane.xlu1 %2759  ;;  %v3423_v2 = vld [vmem:[#allocation2 + $0x118] sm:$0xff] }
0x1032   :  { %4621 = vrcp.f32 %v2760_v36  ;;  %v2763_v37 = vpop.xlane.xlu0 %2762  ;;  %v4488_v4 = vpack.c.bf16 %v3424_v3, %v3423_v2  ;;  %v3655_v2 = vld [vmem:[#allocation2 + $0x198] sm:$0xff]  ;;  %v3656_v3 = vld [vmem:[#allocation2 + $0x1a0] sm:$0xff] }
0x1033   :  { %4325 = vmatmul.mubr.msk.f32.vlgmr.msra.gmra.mrb[20].mxu1 %vm286_vm4, %v2777_v57 }
0x1034   :  { %v4620_v38 = vpop.eup %4619  ;;  %4333 = vmatpush3.msra.mxu1 %v3088_v25  ;;  %4334 = vmatprep.mubr.msk.f32.mxu1 %vm4712_vm3, %v4711_v46 }
0x1035   :  { %v2778_v39 = vmul.f32 %v4620_v38, %v4604_v14  ;;  %v2766_v40 = vpop.xlane.xlu1 %2765  ;;  %4342 = vmatprep.subr.mxu1 %v4711_v46 }
0x1036   :  { %4623 = vrcp.f32 %v2766_v40  ;;  %v2757_v41 = vpop.xlane.xlu0 %2756 }
0x1037   :  { %4625 = vrcp.f32 %v2757_v41  ;;  %4330 = vmatmul.mubr.msk.f32.vlgmr.msra.gmra.mrb[44].mxu0 %vm286_vm4, %v2778_v39 }
0x1038   :  { %4338 = vmatpush3.msra.mxu0 %v3164_v30  ;;  %4339 = vmatprep.mubr.msk.f32.mxu0 %vm4712_vm3, %v4711_v46  ;;  %4627 = vrcp.f32 %v2763_v37 }
0x1039   :  { %4347 = vmatprep.subr.mxu0 %v4711_v46  ;;  %v3316_v44 = vpop.permute.xlu1 %3315 }
0x103a   :  { %v3240_v51 = vpop.permute.xlu0 %3239 }
0x103c   :  { %v4622_v42 = vpop.eup %4621 }
0x103d   :  { %v2780_v43 = vmul.f32 %v4622_v42, %v4606_v18  ;;  %v3553_v42 = vld [vmem:[#allocation2 + $0x128] sm:$0xff] }
0x103f   :  { %4340 = vmatmul.mubr.msk.f32.vlgmr.msra.gmra.mrb[46].mxu0 %vm286_vm4, %v2780_v43  ;;  %v3554_v43 = vld [vmem:[#allocation2 + $0x130] sm:$0xff] }
0x1040   :  { %v4624_v45 = vpop.eup %4623  ;;  %4348 = vmatpush3.msra.mxu0 %v3316_v44  ;;  %4349 = vmatprep.mubr.msk.f32.mxu0 %vm4712_vm3, %v4711_v46  ;;  %v4492_v44 = vpack.c.bf16 %v3554_v43, %v3553_v42 }
0x1041   :  { %v4626_v47 = vpop.eup %4625  ;;  %v2782_v48 = vmul.f32 %v4624_v45, %v4612_v23  ;;  %v3555_v45 = vld [vmem:[#allocation2 + $0x138] sm:$0xff] }
0x1042   :  { %v2779_v49 = vmul.f32 %v4626_v47, %v4610_v22  ;;  %v4628_v50 = vpop.eup %4627  ;;  %4493 = vmatprep.subr.bf16.mxu0 %v4492_v44  ;;  %v3556_v47 = vld [vmem:[#allocation2 + $0x140] sm:$0xff] }
0x1043   :  { %4350 = vmatmul.mubr.msk.f32.vlgmr.msra.gmra.mrb[48].mxu0 %vm286_vm4, %v2782_v48  ;;  %v2781_v52 = vmul.f32 %v4628_v50, %v5141_v19  ;;  %v4496_v48 = vpack.c.bf16 %v3556_v47, %v3555_v45  ;;  %v3646_v50 = vld [vmem:[#allocation2 + $0x150] sm:$0xff] }
0x1044   :  { %4335 = vmatmul.mubr.msk.f32.vlgmr.msra.gmra.mrb[22].mxu1 %vm286_vm4, %v2779_v49  ;;  %4495 = vmatpush3.bf16.msra.mxu0 %v4492_v44  ;;  %v3645_v49 = vld [vmem:[#allocation2 + $0x148] sm:$0xff] }
0x1045   :  { %4343 = vmatpush3.msra.mxu1 %v3240_v51  ;;  %4344 = vmatprep.mubr.msk.f32.mxu1 %vm4712_vm3, %v4711_v46  ;;  %v3647_v51 = vld [vmem:[#allocation2 + $0x158] sm:$0xff] }
0x1046   :  { %4485 = vmatprep.subr.bf16.mxu1 %v4484_v63  ;;  %4497 = vmatprep.subr.bf16.mxu0 %v4496_v48 }
0x1048   :  { %4345 = vmatmul.mubr.msk.f32.vlgmr.msra.gmra.mrb[24].mxu1 %vm286_vm4, %v2781_v52  ;;  %4499 = vmatpush3.bf16.msra.mxu0 %v4496_v48  ;;  %v4500_v52 = vpack.c.bf16 %v3646_v50, %v3645_v49  ;;  %v3777_v50 = vld [vmem:[#allocation2 + $0x1c8] sm:$0xff] }
0x1049   :  { %4487 = vmatpush3.bf16.msra.mxu1 %v4484_v63  ;;  %v3653_v63 = vld [vmem:[#allocation2 + $0x188] sm:$0xff] }
0x104a   :  { %4489 = vmatprep.subr.bf16.mxu1 %v4488_v4 }
0x104d   :  { %4491 = vmatpush3.bf16.msra.mxu1 %v4488_v4  ;;  %v4520_v4 = vpack.c.bf16 %v3656_v3, %v3655_v2  ;;  %v3961_v2 = vld [vmem:[#allocation5 + $0x22] ss:$0 sm:$0xff] }
0x104e   :  { %4501 = vmatprep.subr.bf16.mxu1 %v4500_v52 }
0x10ad   :  { %v2855_v53 = vpop.f32.mrb[18].mxu1 }
0x10ae   :  { %v4316_v55 = vpop.f32.mrb[19].mxu1 }
0x10b9   :  { %v2931_v56 = vpop.f32.mrb[42].mxu0 }
0x10ba   :  { %v4321_v58 = vpop.f32.mrb[43].mxu0 }
0x10bb   :  { %v3650_v58 = vld [vmem:[#allocation2 + $0x170] sm:$0xff] }
0x1106   :  { %v3007_v59 = vpop.f32.mrb[20].mxu1 }
0x1107   :  { %3393 = vrot.lane.b32.xlu0 %v3007_v59, %s4709_s23  ;;  %v4326_v62 = vpop.f32.mrb[21].mxu1 }
0x1108   :  { %v4512_v62 = vpack.c.bf16 %v3652_v61, %v3651_v60  ;;  %v3959_v61 = vld [vmem:[#allocation5 + $0x20] ss:$0 sm:$0xff] }
0x110a   :  { %v3083_v0 = vpop.f32.mrb[44].mxu0 }
0x110b   :  { %3395 = vrot.lane.b32.xlu1 %v3083_v0, %s4709_s23  ;;  %v4331_v1 = vpop.f32.mrb[45].mxu0  ;;  %v3654_v0 = vld [vmem:[#allocation2 + $0x190] sm:$0xff] }
0x110c   :  { %v4516_v1 = vpack.c.bf16 %v3654_v0, %v3653_v63  ;;  %v3960_v63 = vld [vmem:[#allocation5 + $0x21] ss:$0 sm:$0xff] }
0x1112   :  { %v3235_v5 = vpop.f32.mrb[46].mxu0 }
0x1113   :  { %3403 = vrot.lane.b32.xlu1 %v3235_v5, %s4718_s17  ;;  %v4341_v7 = vpop.f32.mrb[47].mxu0  ;;  %v3657_v5 = vld [vmem:[#allocation2 + $0x1a8] sm:$0xff] }
0x1114   :  { %v3658_v7 = vld [vmem:[#allocation2 + $0x1b0] sm:$0xff] }
0x1116   :  { %v3387_v8 = vpop.f32.mrb[48].mxu0 }
0x1117   :  { %v3159_v12 = vpop.f32.mrb[22].mxu1  ;;  %3411 = vrot.lane.b32.xlu1 %v3387_v8, %s4719_s18  ;;  %v4351_v13 = vpop.f32.mrb[49].mxu0  ;;  %v4524_v8 = vpack.c.bf16 %v3658_v7, %v3657_v5 }
0x1118   :  { %3401 = vrot.lane.b32.xlu0 %v3159_v12, %s4718_s17  ;;  %v4336_v14 = vpop.f32.mrb[23].mxu1 }
0x111b   :  { %v3311_v15 = vpop.f32.mrb[24].mxu1 }
0x111c   :  { %3409 = vrot.lane.b32.xlu0 %v3311_v15, %s4719_s18  ;;  %v4346_v16 = vpop.f32.mrb[25].mxu1 }
0x1179   :  { %v3394_v18 = vpop.permute.xlu0 %3393 }
0x117a   :  { %v3415_v21 = vsel %vm286_vm4, %v2855_v53, %v3394_v18  ;;  %v3648_v53 = vld [vmem:[#allocation2 + $0x160] sm:$0xff] }
0x117b   :  { %v4504_v55 = vpack.c.bf16 %v3648_v53, %v3647_v51  ;;  %v3778_v51 = vld [vmem:[#allocation2 + $0x1d0] sm:$0xff]  ;;  %v4720_v53 = vmov 0.0|0.0  }
0x117c   :  { %4532 = vmatprep.subr.bf16.mxu0 %v4720_v53 }
0x117d   :  { %v3396_v17 = vpop.permute.xlu1 %3395 }
0x117e   :  { %v3416_v23 = vsel %vm286_vm4, %v2931_v56, %v3396_v17  ;;  %v3649_v56 = vld [vmem:[#allocation2 + $0x168] sm:$0xff] }
0x117f   :  { %v4508_v59 = vpack.c.bf16 %v3650_v58, %v3649_v56 }
0x1185   :  { %v3404_v19 = vpop.permute.xlu1 %3403 }
0x1186   :  { %v3418_v25 = vsel %vm1615_vm5, %v3416_v23, %v3404_v19  ;;  %v3953_v19 = vld [vmem:[#allocation5 + $0x1c] ss:$0 sm:$0xff] }
0x1189   :  { %v3412_v22 = vpop.permute.xlu1 %3411 }
0x118a   :  { %v3402_v20 = vpop.permute.xlu0 %3401  ;;  %v3420_v28 = vsel %vm1618_vm6, %v3418_v25, %v3412_v22 }
0x118b   :  { %v3417_v24 = vsel %vm1615_vm5, %v3415_v21, %v3402_v20  ;;  %v3954_v21 = vld [vmem:[#allocation5 + $0x1d] ss:$0 sm:$0xff] }
0x118e   :  { %v3410_v10 = vpop.permute.xlu0 %3409 }
0x118f   :  { %v3419_v27 = vsel %vm1618_vm6, %v3417_v24, %v3410_v10 }
0x1190   :  { %4360 = vmatprep.mubr.msk.f32.mxu1 %vm140_vm2, %v3419_v27 }
0x1191   :  { %4361 = vmatmul.mubr.msk.f32.vlgmr.msra.gmra.mrb[26].mxu1 %vm140_vm2, %v3420_v28  ;;  %v3659_v28 = vld [vmem:[#allocation2 + $0x1b8] sm:$0xff] }
0x1192   :  { %4503 = vmatpush3.bf16.msra.mxu1 %v4500_v52  ;;  %v4533_v52 = vpack.c.bf16 %v3778_v51, %v3777_v50 }
0x1193   :  { %4505 = vmatprep.subr.bf16.mxu1 %v4504_v55 }
0x1196   :  { %4507 = vmatpush3.bf16.msra.mxu1 %v4504_v55 }
0x1197   :  { %4509 = vmatprep.subr.bf16.mxu1 %v4508_v59 }
0x119a   :  { %4511 = vmatpush3.bf16.msra.mxu1 %v4508_v59 }
0x119b   :  { %4513 = vmatprep.subr.bf16.mxu1 %v4512_v62 }
0x119e   :  { %4515 = vmatpush3.bf16.msra.mxu1 %v4512_v62 }
0x119f   :  { %4517 = vmatprep.subr.bf16.mxu1 %v4516_v1 }
0x11a2   :  { %4519 = vmatpush3.bf16.msra.mxu1 %v4516_v1 }
0x11a3   :  { %4521 = vmatprep.subr.bf16.mxu1 %v4520_v4 }
0x11a6   :  { %4523 = vmatpush3.bf16.msra.mxu1 %v4520_v4 }
0x11a7   :  { %4525 = vmatprep.subr.bf16.mxu1 %v4524_v8 }
0x11aa   :  { %4527 = vmatpush3.bf16.msra.mxu1 %v4524_v8 }
0x1264   :  { %v4362_v30 = vpop.f32.mrb[26].mxu1 }
0x1265   :  { %v3508_v31 = vadd.f32 %v4362_v30, %v3950_v29  ;;  %v3502_v32 = vpop.f32.mrb[27].mxu1 }
0x1266   :  { %v3503_v33 = vadd.f32 %v3950_v29, %v3502_v32  ;;  %v3660_v29 = vld [vmem:[#allocation2 + $0x1c0] sm:$0xff] }
0x1267   :  { %v5194_v6 = vadd.f32 %v3508_v31, %v4999_v9  ;;  %v4528_v30 = vpack.c.bf16 %v3660_v29, %v3659_v28  ;;  %v3955_v31 = vld [vmem:[#allocation5 + $0x1e] ss:$0 sm:$0xff] }
0x1268   :  { %v5197_v11 = vadd.f32 %v3503_v33, %v5002_v26 }
0x1269   :  { %v3518_v54 = vsel %vm140_vm2, %v5194_v6, 0.0  ;;  %4529 = vmatprep.subr.bf16.mxu1 %v4528_v30 }
0x126a   :  { %3519 = vadd.xlane.f32.xlu1 %v3518_v54  ;;  %v3515_v34 = vsel %vm140_vm2, %v5197_v11, 0.0  ;;  %4531 = vmatpush3.bf16.msra.mxu1 %v4528_v30 }
0x126b   :  { %3516 = vadd.xlane.f32.xlu0 %v3515_v34 }
0x12f7   :  { %v3520_v35 = vpop.xlane.xlu1 %3519 }
0x12f8   :  { %v3522_v57 = vmul.f32 0.03125, %v3520_v35  ;;  %v3517_v36 = vpop.xlane.xlu0 %3516 }
0x12f9   :  { %v3521_v37 = vmul.f32 0.03125, %v3517_v36  ;;  %v3958_v36 = vld [vmem:[#allocation5 + $0x1f] ss:$0 sm:$0xff] }
0x12fa   :  { %v5204_v38 = vsub.f32 %v5194_v6, %v3522_v57 }
0x12fb   :  { %v3523_v9 = vsub.f32 %v5197_v11, %v3521_v37 }
0x12fc   :  { %v3526_v40 = vmul.f32 %v5204_v38, %v5204_v38 }
0x12fd   :  { %v3525_v39 = vmul.f32 %v3523_v9, %v3523_v9 }
0x12fe   :  { %v3530_v41 = vsel %vm140_vm2, %v3526_v40, 0.0 }
0x12ff   :  { %v3527_v26 = vsel %vm140_vm2, %v3525_v39, 0.0 }
0x1300   :  { %3528 = vadd.xlane.f32.xlu0 %v3527_v26 }
0x1304   :  { %3531 = vadd.xlane.f32.xlu0 %v3530_v41 }
0x138d   :  { %v3529_v12 = vpop.xlane.xlu0 %3528 }
0x138e   :  { %v3533_v13 = vmul.f32 0.03125, %v3529_v12 }
0x1390   :  { %v3535_v14 = vadd.f32 1e-05, %v3533_v13 }
0x1391   :  { %v3532_v15 = vpop.xlane.xlu0 %3531 }
0x1392   :  { %4629 = vrsqrt.f32 %v3535_v14  ;;  %v3534_v16 = vmul.f32 0.03125, %v3532_v15 }
0x1394   :  { %v3536_v17 = vadd.f32 1e-05, %v3534_v16 }
0x1396   :  { %4631 = vrsqrt.f32 %v3536_v17 }
0x139c   :  { %v4630_v18 = vpop.eup %4629 }
0x139d   :  { %v3539_v20 = vmul.f32 %v4630_v18, %v3523_v9 }
0x139f   :  { %v3545_v22 = vmul.f32 %v3953_v19, %v3539_v20 }
0x13a0   :  { %v4632_v23 = vpop.eup %4631 }
0x13a1   :  { %v3540_v24 = vmul.f32 %v4632_v23, %v5204_v38  ;;  %v3551_v10 = vadd.f32 %v3954_v21, %v3545_v22 }
0x13a3   :  { %v3546_v25 = vmul.f32 %v3953_v19, %v3540_v24  ;;  %4371 = vmatprep.mubr.msk.f32.mxu0 %vm140_vm2, %v3551_v10 }
0x13a5   :  { %v3552_v27 = vadd.f32 %v3954_v21, %v3546_v25 }
0x13a7   :  { %4372 = vmatmul.mubr.msk.f32.vlgmr.msra.gmra.mrb[50].mxu0 %vm140_vm2, %v3552_v27 }
0x13a8   :  { %4417 = vmatprep.mubr.msk.f32.mxu0 %vm4712_vm3, %v4711_v46  ;;  %4534 = vmatpush3.bf16.msra.mxu0 %v4533_v52 }
0x13a9   :  { %4535 = vmatprep.subr.bf16.mxu0 %v4720_v53 }
0x147a   :  { %v4373_v32 = vpop.f32.mrb[50].mxu0 }
0x147b   :  { %v3640_v33 = vadd.f32 %v4373_v32, %v3955_v31  ;;  %v3634_v54 = vpop.f32.mrb[51].mxu0 }
0x147c   :  { %v3635_v34 = vadd.f32 %v3955_v31, %v3634_v54 }
0x147d   :  { %v3644_v57 = vmax.f32 %v3640_v33, 0.0 }
0x147e   :  { %v3643_v35 = vmax.f32 %v3635_v34, 0.0 }
0x1480   :  { %4406 = vmatprep.mubr.f32.mxu1 %v3643_v35 }
0x1481   :  { %4407 = vmatmul.mubr.f32.vlgmr.msra.gmra.mrb[28].mxu1 %v3644_v57 }
0x1554   :  { %v4408_v37 = vpop.f32.mrb[28].mxu1 }
0x1555   :  { %v3738_v38 = vadd.f32 %v4408_v37, %v3958_v36  ;;  %v3732_v9 = vpop.f32.mrb[29].mxu1 }
0x1556   :  { %v3733_v39 = vadd.f32 %v3958_v36, %v3732_v9 }
0x1557   :  { %v3742_v46 = vadd.f32 %v3738_v38, %v5194_v6  ;;  %v3779_v6 = vld [vmem:[#allocation2 + $0x1d8] sm:$0xff] }
0x1558   :  { %v3741_v26 = vadd.f32 %v3733_v39, %v5197_v11  ;;  %v3780_v11 = vld [vmem:[#allocation2 + $0x1e0] sm:$0xff] }
0x1559   :  { %v3747_v40 = vrot.slane %v3742_v46, 6  ;;  %v4536_v55 = vpack.c.bf16 %v3780_v11, %v3779_v6 }
0x155a   :  { %v3744_v41 = vrot.slane %v3741_v26, 7 }
0x155b   :  { %4537 = vmatpush3.bf16.msra.mxu0 %v4536_v55 }
0x155c   :  { %v3750_v42 = vsel %vm3749_vm7, %v3744_v41, %v3747_v40 }
0x155d   :  { %v3754_v43 = vsel %vm3753_vm8, %v3750_v42, 0.0 }
0x155e   :  { %3755 = vadd.xlane.f32.xlu0 %v3754_v43 }
0x15eb   :  { %v3756_v44 = vpop.xlane.xlu0 %3755 }
0x15ec   :  { %v3757_v45 = vmul.f32 0.03125, %v3756_v44 }
0x15ee   :  { %v3758_v47 = vsub.f32 %v3750_v42, %v3757_v45 }
0x15f0   :  { %v3759_v48 = vmul.f32 %v3758_v47, %v3758_v47 }
0x15f2   :  { %v3760_v49 = vsel %vm3753_vm8, %v3759_v48, 0.0 }
0x15f3   :  { %3761 = vadd.xlane.f32.xlu1 %v3760_v49 }
0x1680   :  { %v3762_v56 = vpop.xlane.xlu1 %3761 }
0x1681   :  { %v3763_v58 = vmul.f32 0.03125, %v3762_v56 }
0x1683   :  { %v3764_v59 = vadd.f32 1e-06, %v3763_v58 }
0x1685   :  { %4633 = vrsqrt.f32 %v3764_v59 }
0x168f   :  { %v4634_v60 = vpop.eup %4633 }
0x1690   :  { %v3766_v62 = vmul.f32 %v4634_v60, %v3758_v47 }
0x1692   :  { %v3771_v0 = vmul.f32 %v3959_v61, %v3766_v62 }
0x1694   :  { %v3776_v1 = vadd.f32 %v3960_v63, %v3771_v0 }
0x1696   :  { %4418 = vmatmul.mubr.msk.f32.vlgmr.msra.gmra.mrb[52].mxu0 %vm140_vm2, %v3776_v1 }
0x1769   :  { %v3855_v3 = vpop.f32.mrb[52].mxu0 }
0x176a   :  { %v3856_v4 = vadd.f32 %v3961_v2, %v3855_v3  ;;  %v4419_v5 = vpop.f32.mrb[53].mxu0 }
0x176c   :  { %v3963_v7 = vclamps-f32 %v3856_v4, 100000.0 }
0x176e   :  { %3861 = vst [vmem:[#allocation7] sm:$0x3] %v3963_v7 }
0x176f   :  { %4690 = shalt.err (!%p4687_p6)
}
0x1770   :  { %s4691_s24 = scalar_lea.hbm %s5234_s3, 32 }
0x1771   :  { %p4692_p7 = scmp.ne.s32.totalorder %s5234_s3, %s4691_s24  ;;  %p4695_p8 = scmp.lt.u32.totalorder %s4691_s24, %s5234_s3 }
0x1773   :  { %p4697_p9 = pnand %p4695_p8, %p4692_p7 }
0x1775   :  { %4700 = shalt.err (!%p4697_p9)
}
0x1776   :  { %3871 = dma.vmem_to_hbm [thread:$0]  %s3869_s20, 32, %s5234_s3, [#allocation4]  }
0x1777   :  { %4705 = dma.done.wait [#allocation4], 32  }
0x1778   :  { %4706 = vsyncadd [#allocation4], 4294967264 }
0x1779   :  { %3875 = vsyncpa [#allocation3], 1 }
0x177a   :  { %3876 = vsyncpa [#allocation6], 1 }
0x177b   :  { %3877 = vsyncpa [#allocation4], 1 }

</bundles_post_ra>
